<compile_context>
chip_gen: v7x
topology: tpu7x:2x2x1
jax: 0.10.0
libtpu: 0.0.40
codegen_flags: <defaults>
</compile_context>

<pallas_src>
import functools
import math

import jax
import jax.numpy as jnp
import numpy as np
from jax.experimental import pallas as pl
from jax.experimental.pallas import tpu as pltpu


_MAX_LANE_TILE = 512            # lane (voxel) tile for tiled convs; multiple of 128
_SUBLANE = 8                    # channel granule for tiled conv outputs
_FUSED_VMEM_BUDGET = 20 << 20   # fused deep stage must stay well inside scoped VMEM


def _round_up(x, m):
    return ((x + m - 1) // m) * m


def _choose_lane_tile(m):
    """Largest lane tile <= _MAX_LANE_TILE (multiple of 128) that keeps the grid
    at >= 4 steps whenever the problem allows it (>= 2 per TensorCore on v7x)."""
    tn = _MAX_LANE_TILE
    while tn > 128 and m < 4 * tn:
        tn //= 2
    return tn


# ---------------------------------------------------------------------------
# Kernel 1: tiled lane-dense conv-as-matmul (conv1 / conv2)
#   out^T (C_pad, tn) = W_b (C_pad, Kp) @ patches^T (Kp, tn)  [ReLU]
# Bias is folded into the last real weight column against a ones-row in the
# patches, so there is no separate bias stream.
# ---------------------------------------------------------------------------
def _convT_kernel(w_ref, p_ref, o_ref, *, relu):
    acc = jnp.dot(w_ref[...], p_ref[...], preferred_element_type=jnp.float32)
    if relu:
        acc = jnp.maximum(acc, 0.0)
    o_ref[...] = acc.astype(o_ref.dtype)


def _conv_tiled(pT, w_b, *, relu):
    """pT: (Kp, M) bf16 patches^T (ones-row + zero rows already appended).
    w_b: (C_pad, Kp) bf16 folded weight.  Returns (C_pad, M) bf16."""
    c_pad, kp = w_b.shape
    kp2, m = pT.shape
    assert kp == kp2, (kp, kp2)
    tn = _choose_lane_tile(m)
    m_pad = _round_up(m, tn)
    if m_pad != m:
        pT = jnp.pad(pT, ((0, 0), (0, m_pad - m)))

    # Explicit VMEM budget: resident weight + double-buffered patch/out tiles.
    blk_bytes = 2 * (c_pad * kp + 2 * kp * tn + 2 * c_pad * tn)
    vmem_limit = int(min(max(4 << 20, 2 * blk_bytes), 64 << 20))

    outT = pl.pallas_call(
        functools.partial(_convT_kernel, relu=relu),
        out_shape=jax.ShapeDtypeStruct((c_pad, m_pad), jnp.bfloat16),
        grid=(m_pad // tn,),
        in_specs=[
            pl.BlockSpec((c_pad, kp), lambda i: (0, 0)),   # weight (same block)
            pl.BlockSpec((kp, tn), lambda i: (0, i)),      # patches^T tile
        ],
        out_specs=pl.BlockSpec((c_pad, tn), lambda i: (0, i)),   # lane-dense store
        compiler_params=pltpu.CompilerParams(
            dimension_semantics=("parallel",),
            vmem_limit_bytes=vmem_limit),
        cost_estimate=pl.CostEstimate(
            flops=2 * c_pad * kp * m_pad,
            transcendentals=0,
            bytes_accessed=2 * (c_pad * kp + kp * m_pad + c_pad * m_pad)),
    )(w_b, pT)
    if m_pad != m:
        outT = outT[:, :m]
    return outT


# ---------------------------------------------------------------------------
# Kernel 2: fused deep stage (conv3 + conv4 + 3 residual blocks), whole-array.
# conv3 is the folded-bias matmul; conv4 / residual convs are a sum over the
# *active* kernel taps  sum_t W_t @ (x @ S_t)  with 0/1 shift matrices S_t, so
# no deep-layer im2col ever touches HBM.  Residual carry stays f32 in-kernel.
# ---------------------------------------------------------------------------
def _deep_kernel(p3_ref, w3_ref, w4_ref, s4_ref, b4_ref, rbw_ref, srb_ref,
                 x3_ref, x4_ref, *, t4, trb, n_blocks, n_convs):
    # conv3 (+bias via ones-row) + ReLU
    x3 = jnp.dot(w3_ref[...], p3_ref[...], preferred_element_type=jnp.float32)
    x3 = jnp.maximum(x3, 0.0)
    x3_ref[...] = x3

    # conv4: sum over active taps, + bias, ReLU
    x3b = x3.astype(jnp.bfloat16)
    acc = None
    for t in range(t4):
        shift = jnp.dot(x3b, s4_ref[t],
                        preferred_element_type=jnp.float32).astype(jnp.bfloat16)
        term = jnp.dot(w4_ref[t], shift, preferred_element_type=jnp.float32)
        acc = term if acc is None else acc + term
    x4 = jnp.maximum(acc + b4_ref[...], 0.0)

    # residual blocks: x + conv(relu(conv(relu(conv(x)))))   (bias-free)
    for blk in range(n_blocks):
        h = x4
        for ci in range(n_convs):
            hb = h.astype(jnp.bfloat16)
            acc = None
            for t in range(trb):
                shift = jnp.dot(hb, srb_ref[t],
                                preferred_element_type=jnp.float32).astype(jnp.bfloat16)
                w = rbw_ref[(blk * n_convs + ci) * trb + t]
                term = jnp.dot(w, shift, preferred_element_type=jnp.float32)
                acc = term if acc is None else acc + term
            h = jnp.maximum(acc, 0.0) if ci + 1 < n_convs else acc
        x4 = x4 + h
    x4_ref[...] = x4


def _deep_fused(p3T, w3b, w4_taps, s4, b4, rbw, s_rb, *, m3, m4, n_blocks):
    c3 = w3b.shape[0]
    c4 = w4_taps.shape[1]
    b4 = b4.reshape(c4, 1).astype(jnp.float32)
    inputs = (p3T, w3b, w4_taps, s4, b4, rbw, s_rb)

    in_bytes = sum(math.prod(a.shape) * a.dtype.itemsize for a in inputs)
    total = in_bytes + 4 * (c3 * m3 + c4 * m4)
    if total > _FUSED_VMEM_BUDGET:
        # TODO(synk): tiled per-conv fallback for deep stages too large to keep
        # VMEM-resident (not reachable at the shapes exercised in this script).
        raise NotImplementedError("deep fused stage is sized for VMEM residency")

    kernel = functools.partial(_deep_kernel, t4=s4.shape[0], trb=s_rb.shape[0],
                               n_blocks=n_blocks, n_convs=3)
    return pl.pallas_call(
        kernel,
        out_shape=(jax.ShapeDtypeStruct((c3, m3), jnp.float32),
                   jax.ShapeDtypeStruct((c4, m4), jnp.float32)),
        compiler_params=pltpu.CompilerParams(
            vmem_limit_bytes=int(min(max(4 << 20, 4 * total), 64 << 20))),
    )(*inputs)


# ---------------------------------------------------------------------------
# im2col / tap-operator glue (XLA ops under jit; see header TODO)
# ---------------------------------------------------------------------------
def _im2col_T(a, k, stride, pad):
    """a: (C, N, D, H, W) -> patches^T (k^3*C, N*Do*Ho*Wo), row order (kd,kh,kw,c)."""
    C, N, D, H, W = a.shape
    ap = jnp.pad(a, ((0, 0), (0, 0), (pad, pad), (pad, pad), (pad, pad)))
    Do = (D + 2 * pad - k) // stride + 1
    Ho = (H + 2 * pad - k) // stride + 1
    Wo = (W + 2 * pad - k) // stride + 1
    taps = []
    for kd in range(k):
        for kh in range(k):
            for kw in range(k):
                taps.append(
                    ap[:, :,
                       kd:kd + Do * stride:stride,
                       kh:kh + Ho * stride:stride,
                       kw:kw + Wo * stride:stride])
    p = jnp.stack(taps, axis=0)                       # (k^3, C, N, Do, Ho, Wo)
    return p.reshape(k * k * k * C, N * Do * Ho * Wo), (N, Do, Ho, Wo)


def _patches_T(a, k, stride, pad, k_padded):
    """im2col^T + ones-row (bias fold) + zero rows up to the weight's Kp."""
    pT, dims = _im2col_T(a, k, stride, pad)
    rows, m = pT.shape
    assert k_padded == _round_up(rows + 1, _SUBLANE), (k_padded, rows)
    pT = jnp.concatenate(
        [pT.astype(jnp.bfloat16), jnp.ones((1, m), jnp.bfloat16)], axis=0)
    if k_padded != rows + 1:
        pT = jnp.pad(pT, ((0, k_padded - rows - 1), (0, 0)))
    return pT, dims


def _conv_taps(N, D, H, W, k, stride, pad):
    """Active conv taps for an (N,D,H,W) spatial grid.  Returns
    ([(kd,kh,kw,S)], (Do,Ho,Wo)) where S is a 0/1 (M_in, M_out) selection
    matrix with at most one 1 per column: (x @ S)[c, m_out] is the tap's
    source voxel (or 0 where the tap reads zero padding)."""
    Do = (D + 2 * pad - k) // stride + 1
    Ho = (H + 2 * pad - k) // stride + 1
    Wo = (W + 2 * pad - k) // stride + 1
    m_in, m_out = N * D * H * W, N * Do * Ho * Wo
    taps = []
    for kd in range(k):
        dsrc = np.arange(Do) * stride - pad + kd
        dok = np.nonzero((dsrc >= 0) & (dsrc < D))[0]
        for kh in range(k):
            hsrc = np.arange(Ho) * stride - pad + kh
            hok = np.nonzero((hsrc >= 0) & (hsrc < H))[0]
            for kw in range(k):
                wsrc = np.arange(Wo) * stride - pad + kw
                wok = np.nonzero((wsrc >= 0) & (wsrc < W))[0]
                if not (len(dok) and len(hok) and len(wok)):
                    continue            # tap only ever reads zero padding -> skip
                S = np.zeros((m_in, m_out), np.float32)
                for n in range(N):
                    for od in dok:
                        for oh in hok:
                            for ow in wok:
                                mi = ((n * D + dsrc[od]) * H + hsrc[oh]) * W + wsrc[ow]
                                mo = ((n * Do + od) * Ho + oh) * Wo + ow
                                S[mi, mo] = 1.0
                taps.append((kd, kh, kw, S))
    return taps, (Do, Ho, Wo)


# ---------------------------------------------------------------------------
# Parameters (deterministic synthetic, PyTorch Conv3d layout/init) + prep
# ---------------------------------------------------------------------------
def init_encoder_params(key, inc, init_channels):
    def wkey():
        nonlocal key
        key, sub = jax.random.split(key)
        return sub

    def conv_w(cout, cin, k):
        bound = 1.0 / math.sqrt(cin * k * k * k)
        return jax.random.uniform(wkey(), (cout, cin, k, k, k),
                                  jnp.float32, -bound, bound)

    def conv_b(cout, cin, k):
        bound = 1.0 / math.sqrt(cin * k * k * k)
        return jax.random.uniform(wkey(), (cout,), jnp.float32, -bound, bound)

    c = init_channels
    params = {
        "conv1_w": conv_w(c, inc, 4),       "conv1_b": conv_b(c, inc, 4),
        "conv2_w": conv_w(2 * c, c, 4),     "conv2_b": conv_b(2 * c, c, 4),
        "conv3_w": conv_w(4 * c, 2 * c, 4), "conv3_b": conv_b(4 * c, 2 * c, 4),
        "conv4_w": conv_w(8 * c, 4 * c, 4), "conv4_b": conv_b(8 * c, 4 * c, 4),
    }
    # ResidualBlock(8c, dropout=False, kernel=3, depth=2, bias=False):
    # [Conv3d, ReLU] x 2 + Conv3d  -> 3 bias-free convs per block.
    for name in ("rb1", "rb2", "rb3"):
        params[name] = [conv_w(8 * c, 8 * c, 3) for _ in range(3)]
    return params


def _fold_conv_weight(w, b, cin_pad, cout_pad):
    """(C_out,C_in,k,k,k)+(C_out,) -> (cout_pad, round_up(k^3*cin_pad+1, 8)) bf16.
    Zero columns for phantom input channels, bias as the last real column
    (matched by a ones-row in the patches), zero rows for phantom output
    channels (which therefore stay exactly zero through the ReLU)."""
    cout, cin, k = w.shape[0], w.shape[1], w.shape[2]
    if cin_pad != cin:
        w = jnp.pad(w, ((0, 0), (0, cin_pad - cin), (0, 0), (0, 0), (0, 0)))
    w2 = jnp.transpose(w, (0, 2, 3, 4, 1)).reshape(cout, k * k * k * cin_pad)
    wb = jnp.concatenate([w2, b.reshape(cout, 1)], axis=1)
    kp = _round_up(wb.shape[1], _SUBLANE)
    wb = jnp.pad(wb, ((0, cout_pad - cout), (0, kp - wb.shape[1])))
    return wb.astype(jnp.bfloat16)


def prepare_params(raw):
    c1 = raw["conv1_w"].shape[0]
    c2 = raw["conv2_w"].shape[0]
    c3 = raw["conv3_w"].shape[0]
    return {
        "conv1_wb": _fold_conv_weight(raw["conv1_w"], raw["conv1_b"],
                                      raw["conv1_w"].shape[1], _round_up(c1, _SUBLANE)),
        "conv2_wb": _fold_conv_weight(raw["conv2_w"], raw["conv2_b"],
                                      _round_up(c1, _SUBLANE), _round_up(c2, _SUBLANE)),
        # conv3 runs inside the fused (whole-array) deep kernel: its input is the
        # channel-aligned conv2 output; its own output needs no channel padding.
        "conv3_wb": _fold_conv_weight(raw["conv3_w"], raw["conv3_b"],
                                      _round_up(c2, _SUBLANE), c3),
        "conv4_w": raw["conv4_w"].astype(jnp.bfloat16),
        "conv4_b": raw["conv4_b"].astype(jnp.float32),
        "rb_w": [w.astype(jnp.bfloat16)
                 for name in ("rb1", "rb2", "rb3") for w in raw[name]],
    }


# ---------------------------------------------------------------------------
# Encoder forward (matches PyTorch Encoder.forward)
# ---------------------------------------------------------------------------
def encoder_forward(x_ncdhw, params, rb=True):
    N = x_ncdhw.shape[0]
    xT = jnp.transpose(x_ncdhw, (1, 0, 2, 3, 4)).astype(jnp.bfloat16)  # (C, N, D, H, W)

    # -- conv1 / conv2: tiled lane-dense Pallas matmuls -----------------------
    p1, (_, D1, H1, W1) = _patches_T(xT, 4, 2, 1, params["conv1_wb"].shape[1])
    a1T = _conv_tiled(p1, params["conv1_wb"], relu=True)       # (C1_pad, N*D1*H1*W1)
    a1 = a1T.reshape(a1T.shape[0], N, D1, H1, W1)              # padded channels carried

    p2, (_, D2, H2, W2) = _patches_T(a1, 4, 2, 1, params["conv2_wb"].shape[1])
    a2T = _conv_tiled(p2, params["conv2_wb"], relu=True)
    a2 = a2T.reshape(a2T.shape[0], N, D2, H2, W2)

    # -- conv3 + conv4 + residual blocks: one fused Pallas kernel -------------
    p3, (_, D3, H3, W3) = _patches_T(a2, 4, 2, 1, params["conv3_wb"].shape[1])
    m3 = N * D3 * H3 * W3

    taps4, (D4, H4, W4) = _conv_taps(N, D3, H3, W3, k=4, stride=2, pad=1)
    m4 = N * D4 * H4 * W4
    w4_taps = jnp.stack([params["conv4_w"][:, :, kd, kh, kw]
                         for (kd, kh, kw, _) in taps4], axis=0)          # (T4, C4, C3)
    s4 = jnp.asarray(np.stack([s for (_, _, _, s) in taps4], axis=0),
                     jnp.bfloat16)                                       # (T4, M3, M4)

    c4 = params["conv4_w"].shape[0]
    if rb:
        tapsr, _ = _conv_taps(N, D4, H4, W4, k=3, stride=1, pad=1)
        rbw = jnp.stack([w[:, :, kd, kh, kw]
                         for w in params["rb_w"]
                         for (kd, kh, kw, _) in tapsr], axis=0)          # (9*Tr, C4, C4)
        s_rb = jnp.asarray(np.stack([s for (_, _, _, s) in tapsr], axis=0),
                           jnp.bfloat16)                                 # (Tr, M4, M4)
        n_blocks = len(params["rb_w"]) // 3
    else:
        rbw = jnp.zeros((1, c4, c4), jnp.bfloat16)
        s_rb = jnp.zeros((1, m4, m4), jnp.bfloat16)
        n_blocks = 0

    a3T, a4T = _deep_fused(p3, params["conv3_wb"], w4_taps, s4, params["conv4_b"],
                           rbw, s_rb, m3=m3, m4=m4, n_blocks=n_blocks)

    # True (unpadded) channel counts; slice only at the four returned scales.
    c3 = params["conv4_w"].shape[1]
    c1, c2 = c3 // 4, c3 // 2

    def to_ncdhw(aT, c, d, h, w):
        a = aT[:c].reshape(c, N, d, h, w)
        return jnp.transpose(a, (1, 0, 2, 3, 4)).astype(jnp.float32)

    return [to_ncdhw(a1T, c1, D1, H1, W1),
            to_ncdhw(a2T, c2, D2, H2, W2),
            to_ncdhw(a3T, c3, D3, H3, W3),
            to_ncdhw(a4T, c4, D4, H4, W4)]


# ---------------------------------------------------------------------------
if __name__ == "__main__":
    key = jax.random.PRNGKey(0)
    k_x, k_p = jax.random.split(key)

    batch, inc, init_channels, spatial = 2, 2, 4, 16
    x = jax.random.normal(k_x, (batch, inc, spatial, spatial, spatial), jnp.float32)

    raw_params = init_encoder_params(k_p, inc, init_channels)
    params = prepare_params(raw_params)

    fwd = jax.jit(functools.partial(encoder_forward, rb=True))
    outs = jax.block_until_ready(fwd(x, params))

    expected = [
        (batch, init_channels,     spatial // 2,  spatial // 2,  spatial // 2),
        (batch, 2 * init_channels, spatial // 4,  spatial // 4,  spatial // 4),
        (batch, 4 * init_channels, spatial // 8,  spatial // 8,  spatial // 8),
        (batch, 8 * init_channels, spatial // 16, spatial // 16, spatial // 16),
    ]
    assert all(tuple(o.shape) == e for o, e in zip(outs, expected)), \
        [o.shape for o in outs]
    assert all(bool(jnp.isfinite(o).all()) for o in outs)

    print("KERNEL_OK")
</pallas_src>

<mosaic_0001>
module attributes {stable_mosaic.version = 11 : i64} {
  func.func @_convT_kernel(%arg0: i32, %arg1: memref<8x136xbf16, #tpu.memory_space<vmem>>, %arg2: memref<136x256xbf16, #tpu.memory_space<vmem>>, %arg3: memref<8x256xbf16, #tpu.memory_space<vmem>>) attributes {dimension_semantics = [#tpu.dimension_semantics<parallel>], iteration_bounds = array<i64: 4>, scalar_prefetch = 0 : i64, scratch_operands = 0 : i64, tpu.core_type = #tpu.core_type<tc>, window_params = [{pipeline_mode = #tpu.pipeline_mode<synchronous>, transform_indices = @transform_0, window_bounds = array<i64: 8, 136>}, {transform_indices = @transform_1, window_bounds = array<i64: 136, 256>}, {transform_indices = @transform_2, window_bounds = array<i64: 8, 256>}]} {
    %c0 = arith.constant 0 : index
    %c0_0 = arith.constant 0 : index
    %0 = vector.load %arg1[%c0, %c0_0] : memref<8x136xbf16, #tpu.memory_space<vmem>>, vector<8x136xbf16>
    %c0_1 = arith.constant 0 : index
    %c0_2 = arith.constant 0 : index
    %1 = vector.load %arg2[%c0_1, %c0_2] : memref<136x256xbf16, #tpu.memory_space<vmem>>, vector<136x256xbf16>
    %cst = arith.constant dense<0.000000e+00> : vector<8x256xf32>
    %2 = tpu.matmul %0, %1, %cst {dimension_numbers = #tpu.dot_dimension_numbers<[1], [0], [0], [1], [0, 0, 1, 1], [], []>} : vector<8x136xbf16>, vector<136x256xbf16>, vector<8x256xf32> -> vector<8x256xf32>
    %cst_3 = arith.constant 0.000000e+00 : f32
    %3 = vector.broadcast %cst_3 : f32 to vector<8x256xf32>
    %4 = arith.maximumf %2, %3 : vector<8x256xf32>
    %5 = arith.truncf %4 : vector<8x256xf32> to vector<8x256xbf16>
    %c0_4 = arith.constant 0 : index
    %c0_5 = arith.constant 0 : index
    %6 = vector.load %arg3[%c0_4, %c0_5] : memref<8x256xbf16, #tpu.memory_space<vmem>>, vector<8x256xbf16>
    tpu.vector_store %arg3[%c0_4, %c0_5], %5 {strides = array<i32>} : memref<8x256xbf16, #tpu.memory_space<vmem>>, vector<8x256xbf16>,
    return
  }
  func.func @transform_0(%arg0: i32) -> (i32, i32) {
    %c0_i32 = arith.constant 0 : i32
    %c0_i32_0 = arith.constant 0 : i32
    %c0_i32_1 = arith.constant 0 : i32
    return %c0_i32, %c0_i32_0 : i32, i32
  }
  func.func @transform_1(%arg0: i32) -> (i32, i32) {
    %c0_i32 = arith.constant 0 : i32
    %c0_i32_0 = arith.constant 0 : i32
    return %c0_i32, %arg0 : i32, i32
  }
  func.func @transform_2(%arg0: i32) -> (i32, i32) {
    %c0_i32 = arith.constant 0 : i32
    %c0_i32_0 = arith.constant 0 : i32
    return %c0_i32, %arg0 : i32, i32
  }
}

module attributes {stable_mosaic.version = 11 : i64} {
  func.func @_convT_kernel(%arg0: i32, %arg1: memref<8x520xbf16, #tpu.memory_space<vmem>>, %arg2: memref<520x128xbf16, #tpu.memory_space<vmem>>, %arg3: memref<8x128xbf16, #tpu.memory_space<vmem>>) attributes {dimension_semantics = [#tpu.dimension_semantics<parallel>], iteration_bounds = array<i64: 1>, scalar_prefetch = 0 : i64, scratch_operands = 0 : i64, tpu.core_type = #tpu.core_type<tc>, window_params = [{pipeline_mode = #tpu.pipeline_mode<synchronous>, transform_indices = @transform_0, window_bounds = array<i64: 8, 520>}, {transform_indices = @transform_1, window_bounds = array<i64: 520, 128>}, {transform_indices = @transform_2, window_bounds = array<i64: 8, 128>}]} {
    %c0 = arith.constant 0 : index
    %c0_0 = arith.constant 0 : index
    %0 = vector.load %arg1[%c0, %c0_0] : memref<8x520xbf16, #tpu.memory_space<vmem>>, vector<8x520xbf16>
    %c0_1 = arith.constant 0 : index
    %c0_2 = arith.constant 0 : index
    %1 = vector.load %arg2[%c0_1, %c0_2] : memref<520x128xbf16, #tpu.memory_space<vmem>>, vector<520x128xbf16>
    %cst = arith.constant dense<0.000000e+00> : vector<8x128xf32>
    %2 = tpu.matmul %0, %1, %cst {dimension_numbers = #tpu.dot_dimension_numbers<[1], [0], [0], [1], [0, 0, 1, 1], [], []>} : vector<8x520xbf16>, vector<520x128xbf16>, vector<8x128xf32> -> vector<8x128xf32>
    %cst_3 = arith.constant 0.000000e+00 : f32
    %3 = vector.broadcast %cst_3 : f32 to vector<8x128xf32>
    %4 = arith.maximumf %2, %3 : vector<8x128xf32>
    %5 = arith.truncf %4 : vector<8x128xf32> to vector<8x128xbf16>
    %c0_4 = arith.constant 0 : index
    %c0_5 = arith.constant 0 : index
    %6 = vector.load %arg3[%c0_4, %c0_5] : memref<8x128xbf16, #tpu.memory_space<vmem>>, vector<8x128xbf16>
    tpu.vector_store %arg3[%c0_4, %c0_5], %5 {strides = array<i32>} : memref<8x128xbf16, #tpu.memory_space<vmem>>, vector<8x128xbf16>,
    return
  }
  func.func @transform_0(%arg0: i32) -> (i32, i32) {
    %c0_i32 = arith.constant 0 : i32
    %c0_i32_0 = arith.constant 0 : i32
    %c0_i32_1 = arith.constant 0 : i32
    return %c0_i32, %c0_i32_0 : i32, i32
  }
  func.func @transform_1(%arg0: i32) -> (i32, i32) {
    %c0_i32 = arith.constant 0 : i32
    %c0_i32_0 = arith.constant 0 : i32
    return %c0_i32, %arg0 : i32, i32
  }
  func.func @transform_2(%arg0: i32) -> (i32, i32) {
    %c0_i32 = arith.constant 0 : i32
    %c0_i32_0 = arith.constant 0 : i32
    return %c0_i32, %arg0 : i32, i32
  }
}

module attributes {stable_mosaic.version = 11 : i64} {
  func.func @_deep_kernel(%arg0: memref<520x16xbf16, #tpu.memory_space<vmem>>, %arg1: memref<16x520xbf16, #tpu.memory_space<vmem>>, %arg2: memref<8x32x16xbf16, #tpu.memory_space<vmem>>, %arg3: memref<8x16x2xbf16, #tpu.memory_space<vmem>>, %arg4: memref<32x1xf32, #tpu.memory_space<vmem>>, %arg5: memref<9x32x32xbf16, #tpu.memory_space<vmem>>, %arg6: memref<1x2x2xbf16, #tpu.memory_space<vmem>>, %arg7: memref<16x16xf32, #tpu.memory_space<vmem>>, %arg8: memref<32x2xf32, #tpu.memory_space<vmem>>) attributes {dimension_semantics = [], scalar_prefetch = 0 : i64, scratch_operands = 0 : i64, tpu.core_type = #tpu.core_type<tc>} {
    %c0 = arith.constant 0 : index
    %c0_0 = arith.constant 0 : index
    %0 = vector.load %arg1[%c0, %c0_0] : memref<16x520xbf16, #tpu.memory_space<vmem>>, vector<16x520xbf16>
    %c0_1 = arith.constant 0 : index
    %c0_2 = arith.constant 0 : index
    %1 = vector.load %arg0[%c0_1, %c0_2] : memref<520x16xbf16, #tpu.memory_space<vmem>>, vector<520x16xbf16>
    %cst = arith.constant dense<0.000000e+00> : vector<16x16xf32>
    %2 = tpu.matmul %0, %1, %cst {dimension_numbers = #tpu.dot_dimension_numbers<[1], [0], [0], [1], [0, 0, 1, 1], [], []>} : vector<16x520xbf16>, vector<520x16xbf16>, vector<16x16xf32> -> vector<16x16xf32>
    %cst_3 = arith.constant 0.000000e+00 : f32
    %3 = vector.broadcast %cst_3 : f32 to vector<16x16xf32>
    %4 = arith.maximumf %2, %3 : vector<16x16xf32>
    %c0_4 = arith.constant 0 : index
    %c0_5 = arith.constant 0 : index
    %5 = vector.load %arg7[%c0_4, %c0_5] : memref<16x16xf32, #tpu.memory_space<vmem>>, vector<16x16xf32>
    tpu.vector_store %arg7[%c0_4, %c0_5], %4 {strides = array<i32>} : memref<16x16xf32, #tpu.memory_space<vmem>>, vector<16x16xf32>,
    %6 = arith.truncf %4 : vector<16x16xf32> to vector<16x16xbf16>
    %c0_6 = arith.constant 0 : index
    %c0_7 = arith.constant 0 : index
    %c0_8 = arith.constant 0 : index
    %7 = vector.load %arg3[%c0_6, %c0_7, %c0_8] : memref<8x16x2xbf16, #tpu.memory_space<vmem>>, vector<1x16x2xbf16>
    %8 = vector.shape_cast %7 : vector<1x16x2xbf16> to vector<16x2xbf16>
    %cst_9 = arith.constant dense<0.000000e+00> : vector<16x2xf32>
    %9 = tpu.matmul %6, %8, %cst_9 {dimension_numbers = #tpu.dot_dimension_numbers<[1], [0], [0], [1], [0, 0, 1, 1], [], []>} : vector<16x16xbf16>, vector<16x2xbf16>, vector<16x2xf32> -> vector<16x2xf32>
    %10 = arith.truncf %9 : vector<16x2xf32> to vector<16x2xbf16>
    %c0_10 = arith.constant 0 : index
    %c0_11 = arith.constant 0 : index
    %c0_12 = arith.constant 0 : index
    %11 = vector.load %arg2[%c0_10, %c0_11, %c0_12] : memref<8x32x16xbf16, #tpu.memory_space<vmem>>, vector<1x32x16xbf16>
    %12 = vector.shape_cast %11 : vector<1x32x16xbf16> to vector<32x16xbf16>
    %cst_13 = arith.constant dense<0.000000e+00> : vector<32x2xf32>
    %13 = tpu.matmul %12, %10, %cst_13 {dimension_numbers = #tpu.dot_dimension_numbers<[1], [0], [0], [1], [0, 0, 1, 1], [], []>} : vector<32x16xbf16>, vector<16x2xbf16>, vector<32x2xf32> -> vector<32x2xf32>
    %c1 = arith.constant 1 : index
    %c0_14 = arith.constant 0 : index
    %c0_15 = arith.constant 0 : index
    %14 = vector.load %arg3[%c1, %c0_14, %c0_15] : memref<8x16x2xbf16, #tpu.memory_space<vmem>>, vector<1x16x2xbf16>
    %15 = vector.shape_cast %14 : vector<1x16x2xbf16> to vector<16x2xbf16>
    %cst_16 = arith.constant dense<0.000000e+00> : vector<16x2xf32>
    %16 = tpu.matmul %6, %15, %cst_16 {dimension_numbers = #tpu.dot_dimension_numbers<[1], [0], [0], [1], [0, 0, 1, 1], [], []>} : vector<16x16xbf16>, vector<16x2xbf16>, vector<16x2xf32> -> vector<16x2xf32>
    %17 = arith.truncf %16 : vector<16x2xf32> to vector<16x2xbf16>
    %c1_17 = arith.constant 1 : index
    %c0_18 = arith.constant 0 : index
    %c0_19 = arith.constant 0 : index
    %18 = vector.load %arg2[%c1_17, %c0_18, %c0_19] : memref<8x32x16xbf16, #tpu.memory_space<vmem>>, vector<1x32x16xbf16>
    %19 = vector.shape_cast %18 : vector<1x32x16xbf16> to vector<32x16xbf16>
    %cst_20 = arith.constant dense<0.000000e+00> : vector<32x2xf32>
    %20 = tpu.matmul %19, %17, %cst_20 {dimension_numbers = #tpu.dot_dimension_numbers<[1], [0], [0], [1], [0, 0, 1, 1], [], []>} : vector<32x16xbf16>, vector<16x2xbf16>, vector<32x2xf32> -> vector<32x2xf32>
    %21 = arith.addf %13, %20 : vector<32x2xf32>
    %c2 = arith.constant 2 : index
    %c0_21 = arith.constant 0 : index
    %c0_22 = arith.constant 0 : index
    %22 = vector.load %arg3[%c2, %c0_21, %c0_22] : memref<8x16x2xbf16, #tpu.memory_space<vmem>>, vector<1x16x2xbf16>
    %23 = vector.shape_cast %22 : vector<1x16x2xbf16> to vector<16x2xbf16>
    %cst_23 = arith.constant dense<0.000000e+00> : vector<16x2xf32>
    %24 = tpu.matmul %6, %23, %cst_23 {dimension_numbers = #tpu.dot_dimension_numbers<[1], [0], [0], [1], [0, 0, 1, 1], [], []>} : vector<16x16xbf16>, vector<16x2xbf16>, vector<16x2xf32> -> vector<16x2xf32>
    %25 = arith.truncf %24 : vector<16x2xf32> to vector<16x2xbf16>
    %c2_24 = arith.constant 2 : index
    %c0_25 = arith.constant 0 : index
    %c0_26 = arith.constant 0 : index
    %26 = vector.load %arg2[%c2_24, %c0_25, %c0_26] : memref<8x32x16xbf16, #tpu.memory_space<vmem>>, vector<1x32x16xbf16>
    %27 = vector.shape_cast %26 : vector<1x32x16xbf16> to vector<32x16xbf16>
    %cst_27 = arith.constant dense<0.000000e+00> : vector<32x2xf32>
    %28 = tpu.matmul %27, %25, %cst_27 {dimension_numbers = #tpu.dot_dimension_numbers<[1], [0], [0], [1], [0, 0, 1, 1], [], []>} : vector<32x16xbf16>, vector<16x2xbf16>, vector<32x2xf32> -> vector<32x2xf32>
    %29 = arith.addf %21, %28 : vector<32x2xf32>
    %c3 = arith.constant 3 : index
    %c0_28 = arith.constant 0 : index
    %c0_29 = arith.constant 0 : index
    %30 = vector.load %arg3[%c3, %c0_28, %c0_29] : memref<8x16x2xbf16, #tpu.memory_space<vmem>>, vector<1x16x2xbf16>
    %31 = vector.shape_cast %30 : vector<1x16x2xbf16> to vector<16x2xbf16>
    %cst_30 = arith.constant dense<0.000000e+00> : vector<16x2xf32>
    %32 = tpu.matmul %6, %31, %cst_30 {dimension_numbers = #tpu.dot_dimension_numbers<[1], [0], [0], [1], [0, 0, 1, 1], [], []>} : vector<16x16xbf16>, vector<16x2xbf16>, vector<16x2xf32> -> vector<16x2xf32>
    %33 = arith.truncf %32 : vector<16x2xf32> to vector<16x2xbf16>
    %c3_31 = arith.constant 3 : index
    %c0_32 = arith.constant 0 : index
    %c0_33 = arith.constant 0 : index
    %34 = vector.load %arg2[%c3_31, %c0_32, %c0_33] : memref<8x32x16xbf16, #tpu.memory_space<vmem>>, vector<1x32x16xbf16>
    %35 = vector.shape_cast %34 : vector<1x32x16xbf16> to vector<32x16xbf16>
    %cst_34 = arith.constant dense<0.000000e+00> : vector<32x2xf32>
    %36 = tpu.matmul %35, %33, %cst_34 {dimension_numbers = #tpu.dot_dimension_numbers<[1], [0], [0], [1], [0, 0, 1, 1], [], []>} : vector<32x16xbf16>, vector<16x2xbf16>, vector<32x2xf32> -> vector<32x2xf32>
    %37 = arith.addf %29, %36 : vector<32x2xf32>
    %c4 = arith.constant 4 : index
    %c0_35 = arith.constant 0 : index
    %c0_36 = arith.constant 0 : index
    %38 = vector.load %arg3[%c4, %c0_35, %c0_36] : memref<8x16x2xbf16, #tpu.memory_space<vmem>>, vector<1x16x2xbf16>
    %39 = vector.shape_cast %38 : vector<1x16x2xbf16> to vector<16x2xbf16>
    %cst_37 = arith.constant dense<0.000000e+00> : vector<16x2xf32>
    %40 = tpu.matmul %6, %39, %cst_37 {dimension_numbers = #tpu.dot_dimension_numbers<[1], [0], [0], [1], [0, 0, 1, 1], [], []>} : vector<16x16xbf16>, vector<16x2xbf16>, vector<16x2xf32> -> vector<16x2xf32>
    %41 = arith.truncf %40 : vector<16x2xf32> to vector<16x2xbf16>
    %c4_38 = arith.constant 4 : index
    %c0_39 = arith.constant 0 : index
    %c0_40 = arith.constant 0 : index
    %42 = vector.load %arg2[%c4_38, %c0_39, %c0_40] : memref<8x32x16xbf16, #tpu.memory_space<vmem>>, vector<1x32x16xbf16>
    %43 = vector.shape_cast %42 : vector<1x32x16xbf16> to vector<32x16xbf16>
    %cst_41 = arith.constant dense<0.000000e+00> : vector<32x2xf32>
    %44 = tpu.matmul %43, %41, %cst_41 {dimension_numbers = #tpu.dot_dimension_numbers<[1], [0], [0], [1], [0, 0, 1, 1], [], []>} : vector<32x16xbf16>, vector<16x2xbf16>, vector<32x2xf32> -> vector<32x2xf32>
    %45 = arith.addf %37, %44 : vector<32x2xf32>
    %c5 = arith.constant 5 : index
    %c0_42 = arith.constant 0 : index
    %c0_43 = arith.constant 0 : index
    %46 = vector.load %arg3[%c5, %c0_42, %c0_43] : memref<8x16x2xbf16, #tpu.memory_space<vmem>>, vector<1x16x2xbf16>
    %47 = vector.shape_cast %46 : vector<1x16x2xbf16> to vector<16x2xbf16>
    %cst_44 = arith.constant dense<0.000000e+00> : vector<16x2xf32>
    %48 = tpu.matmul %6, %47, %cst_44 {dimension_numbers = #tpu.dot_dimension_numbers<[1], [0], [0], [1], [0, 0, 1, 1], [], []>} : vector<16x16xbf16>, vector<16x2xbf16>, vector<16x2xf32> -> vector<16x2xf32>
    %49 = arith.truncf %48 : vector<16x2xf32> to vector<16x2xbf16>
    %c5_45 = arith.constant 5 : index
    %c0_46 = arith.constant 0 : index
    %c0_47 = arith.constant 0 : index
    %50 = vector.load %arg2[%c5_45, %c0_46, %c0_47] : memref<8x32x16xbf16, #tpu.memory_space<vmem>>, vector<1x32x16xbf16>
    %51 = vector.shape_cast %50 : vector<1x32x16xbf16> to vector<32x16xbf16>
    %cst_48 = arith.constant dense<0.000000e+00> : vector<32x2xf32>
    %52 = tpu.matmul %51, %49, %cst_48 {dimension_numbers = #tpu.dot_dimension_numbers<[1], [0], [0], [1], [0, 0, 1, 1], [], []>} : vector<32x16xbf16>, vector<16x2xbf16>, vector<32x2xf32> -> vector<32x2xf32>
    %53 = arith.addf %45, %52 : vector<32x2xf32>
    %c6 = arith.constant 6 : index
    %c0_49 = arith.constant 0 : index
    %c0_50 = arith.constant 0 : index
    %54 = vector.load %arg3[%c6, %c0_49, %c0_50] : memref<8x16x2xbf16, #tpu.memory_space<vmem>>, vector<1x16x2xbf16>
    %55 = vector.shape_cast %54 : vector<1x16x2xbf16> to vector<16x2xbf16>
    %cst_51 = arith.constant dense<0.000000e+00> : vector<16x2xf32>
    %56 = tpu.matmul %6, %55, %cst_51 {dimension_numbers = #tpu.dot_dimension_numbers<[1], [0], [0], [1], [0, 0, 1, 1], [], []>} : vector<16x16xbf16>, vector<16x2xbf16>, vector<16x2xf32> -> vector<16x2xf32>
    %57 = arith.truncf %56 : vector<16x2xf32> to vector<16x2xbf16>
    %c6_52 = arith.constant 6 : index
    %c0_53 = arith.constant 0 : index
    %c0_54 = arith.constant 0 : index
    %58 = vector.load %arg2[%c6_52, %c0_53, %c0_54] : memref<8x32x16xbf16, #tpu.memory_space<vmem>>, vector<1x32x16xbf16>
    %59 = vector.shape_cast %58 : vector<1x32x16xbf16> to vector<32x16xbf16>
    %cst_55 = arith.constant dense<0.000000e+00> : vector<32x2xf32>
    %60 = tpu.matmul %59, %57, %cst_55 {dimension_numbers = #tpu.dot_dimension_numbers<[1], [0], [0], [1], [0, 0, 1, 1], [], []>} : vector<32x16xbf16>, vector<16x2xbf16>, vector<32x2xf32> -> vector<32x2xf32>
    %61 = arith.addf %53, %60 : vector<32x2xf32>
    %c7 = arith.constant 7 : index
    %c0_56 = arith.constant 0 : index
    %c0_57 = arith.constant 0 : index
    %62 = vector.load %arg3[%c7, %c0_56, %c0_57] : memref<8x16x2xbf16, #tpu.memory_space<vmem>>, vector<1x16x2xbf16>
    %63 = vector.shape_cast %62 : vector<1x16x2xbf16> to vector<16x2xbf16>
    %cst_58 = arith.constant dense<0.000000e+00> : vector<16x2xf32>
    %64 = tpu.matmul %6, %63, %cst_58 {dimension_numbers = #tpu.dot_dimension_numbers<[1], [0], [0], [1], [0, 0, 1, 1], [], []>} : vector<16x16xbf16>, vector<16x2xbf16>, vector<16x2xf32> -> vector<16x2xf32>
    %65 = arith.truncf %64 : vector<16x2xf32> to vector<16x2xbf16>
    %c7_59 = arith.constant 7 : index
    %c0_60 = arith.constant 0 : index
    %c0_61 = arith.constant 0 : index
    %66 = vector.load %arg2[%c7_59, %c0_60, %c0_61] : memref<8x32x16xbf16, #tpu.memory_space<vmem>>, vector<1x32x16xbf16>
    %67 = vector.shape_cast %66 : vector<1x32x16xbf16> to vector<32x16xbf16>
    %cst_62 = arith.constant dense<0.000000e+00> : vector<32x2xf32>
    %68 = tpu.matmul %67, %65, %cst_62 {dimension_numbers = #tpu.dot_dimension_numbers<[1], [0], [0], [1], [0, 0, 1, 1], [], []>} : vector<32x16xbf16>, vector<16x2xbf16>, vector<32x2xf32> -> vector<32x2xf32>
    %69 = arith.addf %61, %68 : vector<32x2xf32>
    %c0_63 = arith.constant 0 : index
    %c0_64 = arith.constant 0 : index
    %70 = vector.load %arg4[%c0_63, %c0_64] : memref<32x1xf32, #tpu.memory_space<vmem>>, vector<32x1xf32>
    %71 = vector.broadcast %70 : vector<32x1xf32> to vector<32x2xf32>
    %72 = arith.addf %69, %71 : vector<32x2xf32>
    %cst_65 = arith.constant 0.000000e+00 : f32
    %73 = vector.broadcast %cst_65 : f32 to vector<32x2xf32>
    %74 = arith.maximumf %72, %73 : vector<32x2xf32>
    %75 = arith.truncf %74 : vector<32x2xf32> to vector<32x2xbf16>
    %c0_66 = arith.constant 0 : index
    %c0_67 = arith.constant 0 : index
    %c0_68 = arith.constant 0 : index
    %76 = vector.load %arg6[%c0_66, %c0_67, %c0_68] : memref<1x2x2xbf16, #tpu.memory_space<vmem>>, vector<1x2x2xbf16>
    %77 = vector.shape_cast %76 : vector<1x2x2xbf16> to vector<2x2xbf16>
    %cst_69 = arith.constant dense<0.000000e+00> : vector<32x2xf32>
    %78 = tpu.matmul %75, %77, %cst_69 {dimension_numbers = #tpu.dot_dimension_numbers<[1], [0], [0], [1], [0, 0, 1, 1], [], []>} : vector<32x2xbf16>, vector<2x2xbf16>, vector<32x2xf32> -> vector<32x2xf32>
    %79 = arith.truncf %78 : vector<32x2xf32> to vector<32x2xbf16>
    %c0_70 = arith.constant 0 : index
    %c0_71 = arith.constant 0 : index
    %c0_72 = arith.constant 0 : index
    %80 = vector.load %arg5[%c0_70, %c0_71, %c0_72] : memref<9x32x32xbf16, #tpu.memory_space<vmem>>, vector<1x32x32xbf16>
    %81 = vector.shape_cast %80 : vector<1x32x32xbf16> to vector<32x32xbf16>
    %cst_73 = arith.constant dense<0.000000e+00> : vector<32x2xf32>
    %82 = tpu.matmul %81, %79, %cst_73 {dimension_numbers = #tpu.dot_dimension_numbers<[1], [0], [0], [1], [0, 0, 1, 1], [], []>} : vector<32x32xbf16>, vector<32x2xbf16>, vector<32x2xf32> -> vector<32x2xf32>
    %cst_74 = arith.constant 0.000000e+00 : f32
    %83 = vector.broadcast %cst_74 : f32 to vector<32x2xf32>
    %84 = arith.maximumf %82, %83 : vector<32x2xf32>
    %85 = arith.truncf %84 : vector<32x2xf32> to vector<32x2xbf16>
    %c0_75 = arith.constant 0 : index
    %c0_76 = arith.constant 0 : index
    %c0_77 = arith.constant 0 : index
    %86 = vector.load %arg6[%c0_75, %c0_76, %c0_77] : memref<1x2x2xbf16, #tpu.memory_space<vmem>>, vector<1x2x2xbf16>
    %87 = vector.shape_cast %86 : vector<1x2x2xbf16> to vector<2x2xbf16>
    %cst_78 = arith.constant dense<0.000000e+00> : vector<32x2xf32>
    %88 = tpu.matmul %85, %87, %cst_78 {dimension_numbers = #tpu.dot_dimension_numbers<[1], [0], [0], [1], [0, 0, 1, 1], [], []>} : vector<32x2xbf16>, vector<2x2xbf16>, vector<32x2xf32> -> vector<32x2xf32>
    %89 = arith.truncf %88 : vector<32x2xf32> to vector<32x2xbf16>
    %c1_79 = arith.constant 1 : index
    %c0_80 = arith.constant 0 : index
    %c0_81 = arith.constant 0 : index
    %90 = vector.load %arg5[%c1_79, %c0_80, %c0_81] : memref<9x32x32xbf16, #tpu.memory_space<vmem>>, vector<1x32x32xbf16>
    %91 = vector.shape_cast %90 : vector<1x32x32xbf16> to vector<32x32xbf16>
    %cst_82 = arith.constant dense<0.000000e+00> : vector<32x2xf32>
    %92 = tpu.matmul %91, %89, %cst_82 {dimension_numbers = #tpu.dot_dimension_numbers<[1], [0], [0], [1], [0, 0, 1, 1], [], []>} : vector<32x32xbf16>, vector<32x2xbf16>, vector<32x2xf32> -> vector<32x2xf32>
    %cst_83 = arith.constant 0.000000e+00 : f32
    %93 = vector.broadcast %cst_83 : f32 to vector<32x2xf32>
    %94 = arith.maximumf %92, %93 : vector<32x2xf32>
    %95 = arith.truncf %94 : vector<32x2xf32> to vector<32x2xbf16>
    %c0_84 = arith.constant 0 : index
    %c0_85 = arith.constant 0 : index
    %c0_86 = arith.constant 0 : index
    %96 = vector.load %arg6[%c0_84, %c0_85, %c0_86] : memref<1x2x2xbf16, #tpu.memory_space<vmem>>, vector<1x2x2xbf16>
    %97 = vector.shape_cast %96 : vector<1x2x2xbf16> to vector<2x2xbf16>
    %cst_87 = arith.constant dense<0.000000e+00> : vector<32x2xf32>
    %98 = tpu.matmul %95, %97, %cst_87 {dimension_numbers = #tpu.dot_dimension_numbers<[1], [0], [0], [1], [0, 0, 1, 1], [], []>} : vector<32x2xbf16>, vector<2x2xbf16>, vector<32x2xf32> -> vector<32x2xf32>
    %99 = arith.truncf %98 : vector<32x2xf32> to vector<32x2xbf16>
    %c2_88 = arith.constant 2 : index
    %c0_89 = arith.constant 0 : index
    %c0_90 = arith.constant 0 : index
    %100 = vector.load %arg5[%c2_88, %c0_89, %c0_90] : memref<9x32x32xbf16, #tpu.memory_space<vmem>>, vector<1x32x32xbf16>
    %101 = vector.shape_cast %100 : vector<1x32x32xbf16> to vector<32x32xbf16>
    %cst_91 = arith.constant dense<0.000000e+00> : vector<32x2xf32>
    %102 = tpu.matmul %101, %99, %cst_91 {dimension_numbers = #tpu.dot_dimension_numbers<[1], [0], [0], [1], [0, 0, 1, 1], [], []>} : vector<32x32xbf16>, vector<32x2xbf16>, vector<32x2xf32> -> vector<32x2xf32>
    %103 = arith.addf %74, %102 : vector<32x2xf32>
    %104 = arith.truncf %103 : vector<32x2xf32> to vector<32x2xbf16>
    %c0_92 = arith.constant 0 : index
    %c0_93 = arith.constant 0 : index
    %c0_94 = arith.constant 0 : index
    %105 = vector.load %arg6[%c0_92, %c0_93, %c0_94] : memref<1x2x2xbf16, #tpu.memory_space<vmem>>, vector<1x2x2xbf16>
    %106 = vector.shape_cast %105 : vector<1x2x2xbf16> to vector<2x2xbf16>
    %cst_95 = arith.constant dense<0.000000e+00> : vector<32x2xf32>
    %107 = tpu.matmul %104, %106, %cst_95 {dimension_numbers = #tpu.dot_dimension_numbers<[1], [0], [0], [1], [0, 0, 1, 1], [], []>} : vector<32x2xbf16>, vector<2x2xbf16>, vector<32x2xf32> -> vector<32x2xf32>
    %108 = arith.truncf %107 : vector<32x2xf32> to vector<32x2xbf16>
    %c3_96 = arith.constant 3 : index
    %c0_97 = arith.constant 0 : index
    %c0_98 = arith.constant 0 : index
    %109 = vector.load %arg5[%c3_96, %c0_97, %c0_98] : memref<9x32x32xbf16, #tpu.memory_space<vmem>>, vector<1x32x32xbf16>
    %110 = vector.shape_cast %109 : vector<1x32x32xbf16> to vector<32x32xbf16>
    %cst_99 = arith.constant dense<0.000000e+00> : vector<32x2xf32>
    %111 = tpu.matmul %110, %108, %cst_99 {dimension_numbers = #tpu.dot_dimension_numbers<[1], [0], [0], [1], [0, 0, 1, 1], [], []>} : vector<32x32xbf16>, vector<32x2xbf16>, vector<32x2xf32> -> vector<32x2xf32>
    %cst_100 = arith.constant 0.000000e+00 : f32
    %112 = vector.broadcast %cst_100 : f32 to vector<32x2xf32>
    %113 = arith.maximumf %111, %112 : vector<32x2xf32>
    %114 = arith.truncf %113 : vector<32x2xf32> to vector<32x2xbf16>
    %c0_101 = arith.constant 0 : index
    %c0_102 = arith.constant 0 : index
    %c0_103 = arith.constant 0 : index
    %115 = vector.load %arg6[%c0_101, %c0_102, %c0_103] : memref<1x2x2xbf16, #tpu.memory_space<vmem>>, vector<1x2x2xbf16>
    %116 = vector.shape_cast %115 : vector<1x2x2xbf16> to vector<2x2xbf16>
    %cst_104 = arith.constant dense<0.000000e+00> : vector<32x2xf32>
    %117 = tpu.matmul %114, %116, %cst_104 {dimension_numbers = #tpu.dot_dimension_numbers<[1], [0], [0], [1], [0, 0, 1, 1], [], []>} : vector<32x2xbf16>, vector<2x2xbf16>, vector<32x2xf32> -> vector<32x2xf32>
    %118 = arith.truncf %117 : vector<32x2xf32> to vector<32x2xbf16>
    %c4_105 = arith.constant 4 : index
    %c0_106 = arith.constant 0 : index
    %c0_107 = arith.constant 0 : index
    %119 = vector.load %arg5[%c4_105, %c0_106, %c0_107] : memref<9x32x32xbf16, #tpu.memory_space<vmem>>, vector<1x32x32xbf16>
    %120 = vector.shape_cast %119 : vector<1x32x32xbf16> to vector<32x32xbf16>
    %cst_108 = arith.constant dense<0.000000e+00> : vector<32x2xf32>
    %121 = tpu.matmul %120, %118, %cst_108 {dimension_numbers = #tpu.dot_dimension_numbers<[1], [0], [0], [1], [0, 0, 1, 1], [], []>} : vector<32x32xbf16>, vector<32x2xbf16>, vector<32x2xf32> -> vector<32x2xf32>
    %cst_109 = arith.constant 0.000000e+00 : f32
    %122 = vector.broadcast %cst_109 : f32 to vector<32x2xf32>
    %123 = arith.maximumf %121, %122 : vector<32x2xf32>
    %124 = arith.truncf %123 : vector<32x2xf32> to vector<32x2xbf16>
    %c0_110 = arith.constant 0 : index
    %c0_111 = arith.constant 0 : index
    %c0_112 = arith.constant 0 : index
    %125 = vector.load %arg6[%c0_110, %c0_111, %c0_112] : memref<1x2x2xbf16, #tpu.memory_space<vmem>>, vector<1x2x2xbf16>
    %126 = vector.shape_cast %125 : vector<1x2x2xbf16> to vector<2x2xbf16>
    %cst_113 = arith.constant dense<0.000000e+00> : vector<32x2xf32>
    %127 = tpu.matmul %124, %126, %cst_113 {dimension_numbers = #tpu.dot_dimension_numbers<[1], [0], [0], [1], [0, 0, 1, 1], [], []>} : vector<32x2xbf16>, vector<2x2xbf16>, vector<32x2xf32> -> vector<32x2xf32>
    %128 = arith.truncf %127 : vector<32x2xf32> to vector<32x2xbf16>
    %c5_114 = arith.constant 5 : index
    %c0_115 = arith.constant 0 : index
    %c0_116 = arith.constant 0 : index
    %129 = vector.load %arg5[%c5_114, %c0_115, %c0_116] : memref<9x32x32xbf16, #tpu.memory_space<vmem>>, vector<1x32x32xbf16>
    %130 = vector.shape_cast %129 : vector<1x32x32xbf16> to vector<32x32xbf16>
    %cst_117 = arith.constant dense<0.000000e+00> : vector<32x2xf32>
    %131 = tpu.matmul %130, %128, %cst_117 {dimension_numbers = #tpu.dot_dimension_numbers<[1], [0], [0], [1], [0, 0, 1, 1], [], []>} : vector<32x32xbf16>, vector<32x2xbf16>, vector<32x2xf32> -> vector<32x2xf32>
    %132 = arith.addf %103, %131 : vector<32x2xf32>
    %133 = arith.truncf %132 : vector<32x2xf32> to vector<32x2xbf16>
    %c0_118 = arith.constant 0 : index
    %c0_119 = arith.constant 0 : index
    %c0_120 = arith.constant 0 : index
    %134 = vector.load %arg6[%c0_118, %c0_119, %c0_120] : memref<1x2x2xbf16, #tpu.memory_space<vmem>>, vector<1x2x2xbf16>
    %135 = vector.shape_cast %134 : vector<1x2x2xbf16> to vector<2x2xbf16>
    %cst_121 = arith.constant dense<0.000000e+00> : vector<32x2xf32>
    %136 = tpu.matmul %133, %135, %cst_121 {dimension_numbers = #tpu.dot_dimension_numbers<[1], [0], [0], [1], [0, 0, 1, 1], [], []>} : vector<32x2xbf16>, vector<2x2xbf16>, vector<32x2xf32> -> vector<32x2xf32>
    %137 = arith.truncf %136 : vector<32x2xf32> to vector<32x2xbf16>
    %c6_122 = arith.constant 6 : index
    %c0_123 = arith.constant 0 : index
    %c0_124 = arith.constant 0 : index
    %138 = vector.load %arg5[%c6_122, %c0_123, %c0_124] : memref<9x32x32xbf16, #tpu.memory_space<vmem>>, vector<1x32x32xbf16>
    %139 = vector.shape_cast %138 : vector<1x32x32xbf16> to vector<32x32xbf16>
    %cst_125 = arith.constant dense<0.000000e+00> : vector<32x2xf32>
    %140 = tpu.matmul %139, %137, %cst_125 {dimension_numbers = #tpu.dot_dimension_numbers<[1], [0], [0], [1], [0, 0, 1, 1], [], []>} : vector<32x32xbf16>, vector<32x2xbf16>, vector<32x2xf32> -> vector<32x2xf32>
    %cst_126 = arith.constant 0.000000e+00 : f32
    %141 = vector.broadcast %cst_126 : f32 to vector<32x2xf32>
    %142 = arith.maximumf %140, %141 : vector<32x2xf32>
    %143 = arith.truncf %142 : vector<32x2xf32> to vector<32x2xbf16>
    %c0_127 = arith.constant 0 : index
    %c0_128 = arith.constant 0 : index
    %c0_129 = arith.constant 0 : index
    %144 = vector.load %arg6[%c0_127, %c0_128, %c0_129] : memref<1x2x2xbf16, #tpu.memory_space<vmem>>, vector<1x2x2xbf16>
    %145 = vector.shape_cast %144 : vector<1x2x2xbf16> to vector<2x2xbf16>
    %cst_130 = arith.constant dense<0.000000e+00> : vector<32x2xf32>
    %146 = tpu.matmul %143, %145, %cst_130 {dimension_numbers = #tpu.dot_dimension_numbers<[1], [0], [0], [1], [0, 0, 1, 1], [], []>} : vector<32x2xbf16>, vector<2x2xbf16>, vector<32x2xf32> -> vector<32x2xf32>
    %147 = arith.truncf %146 : vector<32x2xf32> to vector<32x2xbf16>
    %c7_131 = arith.constant 7 : index
    %c0_132 = arith.constant 0 : index
    %c0_133 = arith.constant 0 : index
    %148 = vector.load %arg5[%c7_131, %c0_132, %c0_133] : memref<9x32x32xbf16, #tpu.memory_space<vmem>>, vector<1x32x32xbf16>
    %149 = vector.shape_cast %148 : vector<1x32x32xbf16> to vector<32x32xbf16>
    %cst_134 = arith.constant dense<0.000000e+00> : vector<32x2xf32>
    %150 = tpu.matmul %149, %147, %cst_134 {dimension_numbers = #tpu.dot_dimension_numbers<[1], [0], [0], [1], [0, 0, 1, 1], [], []>} : vector<32x32xbf16>, vector<32x2xbf16>, vector<32x2xf32> -> vector<32x2xf32>
    %cst_135 = arith.constant 0.000000e+00 : f32
    %151 = vector.broadcast %cst_135 : f32 to vector<32x2xf32>
    %152 = arith.maximumf %150, %151 : vector<32x2xf32>
    %153 = arith.truncf %152 : vector<32x2xf32> to vector<32x2xbf16>
    %c0_136 = arith.constant 0 : index
    %c0_137 = arith.constant 0 : index
    %c0_138 = arith.constant 0 : index
    %154 = vector.load %arg6[%c0_136, %c0_137, %c0_138] : memref<1x2x2xbf16, #tpu.memory_space<vmem>>, vector<1x2x2xbf16>
    %155 = vector.shape_cast %154 : vector<1x2x2xbf16> to vector<2x2xbf16>
    %cst_139 = arith.constant dense<0.000000e+00> : vector<32x2xf32>
    %156 = tpu.matmul %153, %155, %cst_139 {dimension_numbers = #tpu.dot_dimension_numbers<[1], [0], [0], [1], [0, 0, 1, 1], [], []>} : vector<32x2xbf16>, vector<2x2xbf16>, vector<32x2xf32> -> vector<32x2xf32>
    %157 = arith.truncf %156 : vector<32x2xf32> to vector<32x2xbf16>
    %c8 = arith.constant 8 : index
    %c0_140 = arith.constant 0 : index
    %c0_141 = arith.constant 0 : index
    %158 = vector.load %arg5[%c8, %c0_140, %c0_141] : memref<9x32x32xbf16, #tpu.memory_space<vmem>>, vector<1x32x32xbf16>
    %159 = vector.shape_cast %158 : vector<1x32x32xbf16> to vector<32x32xbf16>
    %cst_142 = arith.constant dense<0.000000e+00> : vector<32x2xf32>
    %160 = tpu.matmul %159, %157, %cst_142 {dimension_numbers = #tpu.dot_dimension_numbers<[1], [0], [0], [1], [0, 0, 1, 1], [], []>} : vector<32x32xbf16>, vector<32x2xbf16>, vector<32x2xf32> -> vector<32x2xf32>
    %161 = arith.addf %132, %160 : vector<32x2xf32>
    %c0_143 = arith.constant 0 : index
    %c0_144 = arith.constant 0 : index
    %162 = vector.load %arg8[%c0_143, %c0_144] : memref<32x2xf32, #tpu.memory_space<vmem>>, vector<32x2xf32>
    tpu.vector_store %arg8[%c0_143, %c0_144], %161 {strides = array<i32>} : memref<32x2xf32, #tpu.memory_space<vmem>>, vector<32x2xf32>,
    return
  }
}

</mosaic_0001>

<bundles_post_ra>
// kernel: encoder_forward.3
= control target key start
LH: loop header
LB: loop body
LE: loop exit
PB: predicated region body
PF: predicated region fallthrough
CT: control target
= control target key end

     0   :  { %s609_s9 = smov 0   ;;  %s611_s10 = smov 0   ;;  %s702_s0 = inlined_call_operand.vmem [shape: bf16[8,136], index: 0, kind: input, shape index: {}]   ;;  %s703_s1 = inlined_call_operand.vmem [shape: bf16[136,1024], index: 1, kind: input, shape index: {}]   ;;  %s704_s2 = inlined_call_operand.vmem [shape: bf16[8,1024], index: 2, kind: output, shape index: {}]  }
   0x1   :  { %s613_s11 = smov 0  }
   0x2 LB: > { %s480_s12 = sadd.s32 4294967295, %s592_s11   ;;  %s626_s13 = sadd.s32 1, %s592_s11   ;;  %s592_s11 = sphi %s613_s11, %s707_s11   ;;  %s588_s10 = sphi %s611_s10, %s706_s10   ;;  %s584_s9 = sphi %s609_s9, %s705_s9  }
   0x3   : > { %s37_s14 = ssub.s32 %s592_s11, %s626_s13  ;;  %s40_s15 = sadd.s32 1, %s588_s10 }
   0x4   : > { %p38_p0 = scmp.eq.s32.totalorder %s37_s14, 0  ;;  %p47_p1 = scmp.ne.s32.totalorder %s588_s10, %s584_s9 }
   0x5   : > { %p48_p2 = scmp.eq.s32.totalorder %s592_s11, 0  ;;  %p483_p4 = scmp.ge.s32.totalorder %s592_s11, 4 }
   0x6   : > { %s635_s16 = scalar_select %p38_p0, %s588_s10, %s40_s15  }
   0x7   : > { %p49_p3 = por %p48_p2, %p47_p1  ;;  %102 = sbr.rel (%p483_p4) target bundleno = 35 (0x23), region = 20 }
   0xe   : > { %105 = sbr.rel (!%p49_p3) target bundleno = 35 (0x23), region = 24  ;;  %s107_s17 = sand.u32 (%p49_p3), 1, %s588_s10  }
   0xf   : > { %s514_s18 = sshll.u32 (%p49_p3), %s592_s11, 3  ;;  %s516_s19 = smul.u32 (%p49_p3), 136, %s107_s17 }
  0x10   : > { %s643_s22 = scalar_lea.vmem (%p49_p3), %s703_s1, %s514_s18 }
  0x11   : > { %v172_v0 = vld [vmem:[%s643_s22] sm:$0xff] (%p49_p3)  ;;  %s109_s23 = scalar_lea.vmem (%p49_p3), [#allocation2], %s516_s19 }
  0x12   : > { %v174_v1 = vld [vmem:[%s643_s22 + $0x20] sm:$0xff] (%p49_p3)  ;;  %173 = vst [vmem:[%s109_s23] sm:$0xff] (%p49_p3), %v172_v0 }
  0x13   : > { %v176_v2 = vld [vmem:[%s643_s22 + $0x40] sm:$0xff] (%p49_p3)  ;;  %175 = vst [vmem:[%s109_s23 + $0x8] sm:$0xff] (%p49_p3), %v174_v1 }
  0x14   : > { %v178_v3 = vld [vmem:[%s643_s22 + $0x60] sm:$0xff] (%p49_p3)  ;;  %177 = vst [vmem:[%s109_s23 + $0x10] sm:$0xff] (%p49_p3), %v176_v2 }
  0x15   : > { %v180_v4 = vld [vmem:[%s643_s22 + $0x80] sm:$0xff]  ;;  %179 = vst [vmem:[%s109_s23 + $0x18] sm:$0xff] %v178_v3 }
  0x16   : > { %v182_v5 = vld [vmem:[%s643_s22 + $0xa0] sm:$0xff]  ;;  %181 = vst [vmem:[%s109_s23 + $0x20] sm:$0xff] %v180_v4 }
  0x17   : > { %183 = vst [vmem:[%s109_s23 + $0x28] sm:$0xff] %v182_v5  ;;  %v184_v6 = vld [vmem:[%s643_s22 + $0xc0] sm:$0xff] }
  0x18   : > { %v186_v7 = vld [vmem:[%s643_s22 + $0xe0] sm:$0xff]  ;;  %185 = vst [vmem:[%s109_s23 + $0x30] sm:$0xff] %v184_v6 }
  0x19   : > { %v188_v8 = vld [vmem:[%s643_s22 + $0x100] sm:$0xff]  ;;  %187 = vst [vmem:[%s109_s23 + $0x38] sm:$0xff] %v186_v7 }
  0x1a   : > { %189 = vst [vmem:[%s109_s23 + $0x40] sm:$0xff] %v188_v8  ;;  %v190_v9 = vld [vmem:[%s643_s22 + $0x120] sm:$0xff] }
  0x1b   : > { %v192_v10 = vld [vmem:[%s643_s22 + $0x140] sm:$0xff]  ;;  %191 = vst [vmem:[%s109_s23 + $0x48] sm:$0xff] %v190_v9 }
  0x1c   : > { %v194_v11 = vld [vmem:[%s643_s22 + $0x160] sm:$0xff]  ;;  %193 = vst [vmem:[%s109_s23 + $0x50] sm:$0xff] %v192_v10 }
  0x1d   : > { %195 = vst [vmem:[%s109_s23 + $0x58] sm:$0xff] %v194_v11  ;;  %v196_v12 = vld [vmem:[%s643_s22 + $0x180] sm:$0xff] }
  0x1e   : > { %v198_v13 = vld [vmem:[%s643_s22 + $0x1a0] sm:$0xff]  ;;  %197 = vst [vmem:[%s109_s23 + $0x60] sm:$0xff] %v196_v12 }
  0x1f   : > { %v200_v14 = vld [vmem:[%s643_s22 + $0x1c0] sm:$0xff]  ;;  %199 = vst [vmem:[%s109_s23 + $0x68] sm:$0xff] %v198_v13 }
  0x20   : > { %201 = vst [vmem:[%s109_s23 + $0x70] sm:$0xff] %v200_v14  ;;  %v202_v15 = vld [vmem:[%s643_s22 + $0x1e0] sm:$0xff] }
  0x21   : > { %v204_v16 = vld [vmem:[%s643_s22 + $0x200] sm:$0xff]  ;;  %203 = vst [vmem:[%s109_s23 + $0x78] sm:$0xff] %v202_v15 }
  0x22   : > { %205 = vst [vmem:[%s109_s23 + $0x80] sm:$0xff] %v204_v16 }
  0x23 PF: > { %p486_p5 = scmp.ge.s32.totalorder %s592_s11, 1  ;;  %p210_p6 = scmp.lt.s32.totalorder %s592_s11, 5 }
  0x25   : > { %p211_p7 = pnand %p486_p5, %p210_p6 }
  0x26   : > { %s217_s24 = sand.u32 (!%p211_p7), 1, %s584_s9   ;;  %v246_v17 = vld [vmem:[%s702_s0] sm:$0xff] (!%p211_p7)  ;;  %vm355_vm0 = vcmask (!%p211_p7), 64512   ;;  %vm359_vm1 = vcmask (!%p211_p7), 1043456   ;;  %s487_s29 = sshll.u32 (!%p211_p7), %s480_s12, 1 }
  0x27   : > { %214 = sbr.rel (%p211_p7) target bundleno = 298 (0x12a), region = 62  ;;  %v490_v18 = vcombine.high (!%p211_p7), %v246_v17, %v246_v17  ;;  %v489_v39 = vcombine.low (!%p211_p7), %v246_v17, %v246_v17  ;;  %p240_p8 = scmp.lt.s32.totalorder (!%p211_p7), %s487_s29, 7 }
  0x28   : > { %s517_s27 = smul.u32 (!%p211_p7), 136, %s217_s24 }
  0x29   : > { %510 = vmatprep.mubr.msk.bf16.mxu0 (!%p211_p7), %vm355_vm0, %v490_v18 }
  0x2a   : > { %s668_s28 = scalar_lea.vmem (!%p211_p7), [#allocation2], %s517_s27 }
  0x2b   : > { %v542_v19 = vld [vmem:[%s668_s28 + $0x4] ss:$8 sps:$4 sm:$0xff] (!%p211_p7)   ;;  %v544_v20 = vld [vmem:[%s668_s28] ss:$8 sps:$4 sm:$0xff] (!%p211_p7)   ;;  %v545_v21 = vld [vmem:[%s668_s28 + $0x14] ss:$8 sps:$4 sm:$0xff] (!%p211_p7)  }
  0x2c   : > { %366 = vmatprep.subr.bf16.mxu0 (!%p211_p7), %v542_v19  ;;  %v547_v22 = vld [vmem:[%s668_s28 + $0x10] ss:$8 sps:$4 sm:$0xff] (!%p211_p7)   ;;  %v548_v23 = vld [vmem:[%s668_s28 + $0x24] ss:$8 sps:$4 sm:$0xff] (!%p211_p7)   ;;  %v550_v24 = vld [vmem:[%s668_s28 + $0x20] ss:$8 sps:$4 sm:$0xff] (!%p211_p7)  }
  0x2d   : > { %367 = vmatpush1.bf16.msra.mxu0 (!%p211_p7), %v544_v20  ;;  %v551_v25 = vld [vmem:[%s668_s28 + $0x34] ss:$8 sps:$4 sm:$0xff] (!%p211_p7)   ;;  %v553_v26 = vld [vmem:[%s668_s28 + $0x30] ss:$8 sps:$4 sm:$0xff] (!%p211_p7)   ;;  %v554_v27 = vld [vmem:[%s668_s28 + $0x44] ss:$8 sps:$4 sm:$0xff] (!%p211_p7)  }
  0x2e   : > { %368 = vmatprep.subr.bf16.mxu0 %v545_v21  ;;  %v556_v28 = vld [vmem:[%s668_s28 + $0x40] ss:$8 sps:$4 sm:$0xff]   ;;  %v557_v29 = vld [vmem:[%s668_s28 + $0x54] ss:$8 sps:$4 sm:$0xff]   ;;  %v559_v30 = vld [vmem:[%s668_s28 + $0x50] ss:$8 sps:$4 sm:$0xff]  }
  0x2f   : > { %v560_v31 = vld [vmem:[%s668_s28 + $0x64] ss:$8 sps:$4 sm:$0xff]   ;;  %v562_v32 = vld [vmem:[%s668_s28 + $0x60] ss:$8 sps:$4 sm:$0xff]   ;;  %v563_v33 = vld [vmem:[%s668_s28 + $0x74] ss:$8 sps:$4 sm:$0xff]  }
  0x30   : > { %v263_v34 = vld [vmem:[%s668_s28 + $0x80] sm:$0xff]  ;;  %v565_v35 = vld [vmem:[%s668_s28 + $0x70] ss:$8 sps:$4 sm:$0xff]   ;;  %s709_s29 = smov (!%p240_p8, %s487_s29), 7 }
  0x31   : > { %369 = vmatpush1.bf16.msra.mxu0 %v547_v22  ;;  %v508_v36 = vcombine.high %v263_v34, %v263_v34  ;;  %v507_v37 = vcombine.low %v263_v34, %v263_v34  ;;  %s488_s30 = sshll.u32 %s709_s29, 2 }
  0x32   : > { %370 = vmatprep.subr.bf16.mxu0 %v548_v23  ;;  %s243_s5 = scalar_lea.vmem %s704_s2, %s488_s30 }
  0x33   : > { %v361_v38 = vsel %vm359_vm1, %v507_v37, 0 }
  0x35   : > { %371 = vmatpush1.bf16.msra.mxu0 %v550_v24 }
  0x36   : > { %372 = vmatprep.subr.bf16.mxu0 %v551_v25 }
  0x39   : > { %373 = vmatpush1.bf16.msra.mxu0 %v553_v26 }
  0x3a   : > { %374 = vmatprep.subr.bf16.mxu0 %v554_v27 }
  0x3d   : > { %375 = vmatpush1.bf16.msra.mxu0 %v556_v28 }
  0x3e   : > { %376 = vmatprep.subr.bf16.mxu0 %v557_v29 }
  0x41   : > { %377 = vmatpush1.bf16.msra.mxu0 %v559_v30 }
  0x42   : > { %378 = vmatprep.subr.bf16.mxu0 %v560_v31 }
  0x45   : > { %379 = vmatpush1.bf16.msra.mxu0 %v562_v32 }
  0x46   : > { %380 = vmatprep.subr.bf16.mxu0 %v563_v33 }
  0x49   : > { %381 = vmatpush1.bf16.msra.mxu0 %v565_v35 }
  0x4a   : > { %509 = vmatprep.subr.msk.bf16.mxu0 %vm359_vm1, %v508_v36 }
  0x4d   : > { %383 = vmatpush1.bf16.msra.mxu0 %v361_v38 }
  0x50   : > { %399 = vmatmul.mubr.bf16.vlgmr.msra.gmra.mrb[0].mxu0 %v489_v39 }
 0x123   : > { %v400_v40 = vpop.f32.mrb[0].mxu0 }
 0x124   : > { %v407_v41 = vmax.f32 %v400_v40, 0.0  ;;  %v402_v42 = vpop.f32.mrb[1].mxu0 }
 0x125   : > { %v408_v43 = vmax.f32 %v402_v42, 0.0  ;;  %v404_v44 = vpop.f32.mrb[2].mxu0 }
 0x126   : > { %v405_v45 = vpop.f32.mrb[3].mxu0 }
 0x127   : > { %v515_v46 = vpack.c.bf16 %v408_v43, %v407_v41 }
 0x129   : > { %417 = vst [vmem:[%s243_s5] sm:$0xff] %v515_v46 }
 0x12a PF: > { %p9_p9 = scmp.ge.s32.totalorder %s626_s13, 6   ;;  %s705_s9 = smov %s588_s10 }
 0x12b   : > { %s706_s10 = smov %s635_s16  ;;  %s707_s11 = smov %s626_s13 }
 0x12c   :  { %11 = sbr.rel (!%p9_p9) target bundleno = 2 (0x2), region = 101 }

// kernel: encoder_forward.4
= control target key start
LH: loop header
LB: loop body
LE: loop exit
PB: predicated region body
PF: predicated region fallthrough
CT: control target
= control target key end

     0   :  { %vm296_vm0 = vcmask 1043456   ;;  %v558_v36 = vmov 0.0   ;;  %vm559_vm1 = vmmov 0   ;;  %vm292_vm2 = vcmask 64512   ;;  %s686_s1 = inlined_call_operand.vmem [shape: bf16[520,128], index: 1, kind: input, shape index: {}]   ;;  %s687_s0 = inlined_call_operand.vmem [shape: bf16[8,520], index: 0, kind: input, shape index: {}]   ;;  %s688_s2 = inlined_call_operand.vmem [shape: bf16[8,128], index: 2, kind: output, shape index: {}]  }
   0x1   :  { %v520_v0 = vld [vmem:[%s686_s1 + $0x40] sm:$0xff]   ;;  %v524_v4 = vld [vmem:[%s686_s1 + $0x48] sm:$0xff]   ;;  %v528_v8 = vld [vmem:[%s686_s1 + $0x50] sm:$0xff]  }
   0x2   :  { %v521_v1 = vld [vmem:[%s686_s1 + $0xc0] sm:$0xff]   ;;  %466 = vmatprep.subr.bf16.mxu0 %v520_v0  ;;  %v525_v5 = vld [vmem:[%s686_s1 + $0xc8] sm:$0xff]   ;;  %v529_v9 = vld [vmem:[%s686_s1 + $0xd0] sm:$0xff]  }
   0x3   :  { %v522_v2 = vld [vmem:[%s686_s1] sm:$0xff]   ;;  %488 = vmatprep.subr.bf16.mxu1 %v521_v1  ;;  %v526_v6 = vld [vmem:[%s686_s1 + $0x8] sm:$0xff]   ;;  %v530_v10 = vld [vmem:[%s686_s1 + $0x10] sm:$0xff]  }
   0x4   :  { %v523_v3 = vld [vmem:[%s686_s1 + $0x80] sm:$0xff]   ;;  %467 = vmatpush3.bf16.msra.mxu0 %v522_v2  ;;  %v527_v7 = vld [vmem:[%s686_s1 + $0x88] sm:$0xff]   ;;  %v531_v11 = vld [vmem:[%s686_s1 + $0x90] sm:$0xff]  }
   0x5   :  { %489 = vmatpush3.bf16.msra.mxu1 %v523_v3  ;;  %468 = vmatprep.subr.bf16.mxu0 %v524_v4  ;;  %v532_v12 = vld [vmem:[%s686_s1 + $0x58] sm:$0xff]   ;;  %v536_v16 = vld [vmem:[%s686_s1 + $0x60] sm:$0xff]   ;;  %v540_v20 = vld [vmem:[%s686_s1 + $0x68] sm:$0xff]  }
   0x6   :  { %490 = vmatprep.subr.bf16.mxu1 %v525_v5  ;;  %v533_v13 = vld [vmem:[%s686_s1 + $0xd8] sm:$0xff]   ;;  %v537_v17 = vld [vmem:[%s686_s1 + $0xe0] sm:$0xff]   ;;  %v541_v21 = vld [vmem:[%s686_s1 + $0xe8] sm:$0xff]  }
   0x7   :  { %v534_v14 = vld [vmem:[%s686_s1 + $0x18] sm:$0xff]   ;;  %v538_v18 = vld [vmem:[%s686_s1 + $0x20] sm:$0xff]   ;;  %v542_v22 = vld [vmem:[%s686_s1 + $0x28] sm:$0xff]  }
   0x8   :  { %469 = vmatpush3.bf16.msra.mxu0 %v526_v6  ;;  %v535_v15 = vld [vmem:[%s686_s1 + $0x98] sm:$0xff]   ;;  %v539_v19 = vld [vmem:[%s686_s1 + $0xa0] sm:$0xff]   ;;  %v543_v23 = vld [vmem:[%s686_s1 + $0xa8] sm:$0xff]  }
   0x9   :  { %491 = vmatpush3.bf16.msra.mxu1 %v527_v7  ;;  %470 = vmatprep.subr.bf16.mxu0 %v528_v8  ;;  %v544_v24 = vld [vmem:[%s686_s1 + $0x70] sm:$0xff]   ;;  %v548_v28 = vld [vmem:[%s686_s1 + $0x78] sm:$0xff]   ;;  %v12_v32 = vld [vmem:[%s687_s0] sm:$0xff] }
   0xa   :  { %492 = vmatprep.subr.bf16.mxu1 %v529_v9  ;;  %v545_v25 = vld [vmem:[%s686_s1 + $0xf0] sm:$0xff]   ;;  %v549_v29 = vld [vmem:[%s686_s1 + $0xf8] sm:$0xff]   ;;  %v427_v33 = vcombine.low %v12_v32, %v12_v32  ;;  %v428_v34 = vcombine.high %v12_v32, %v12_v32  ;;  %v13_v35 = vld [vmem:[%s687_s0 + $0x8] sm:$0xff] }
   0xb   :  { %v546_v26 = vld [vmem:[%s686_s1 + $0x30] sm:$0xff]   ;;  %v550_v30 = vld [vmem:[%s686_s1 + $0x38] sm:$0xff]   ;;  %v557_v37 = vld [vmem:[%s686_s1 + $0x100] ss:$0 sps:$4 sm:$0xff]   ;;  %v429_v38 = vcombine.low %v13_v35, %v13_v35  ;;  %v430_v39 = vcombine.high %v13_v35, %v13_v35 }
   0xc   :  { %471 = vmatpush3.bf16.msra.mxu0 %v530_v10  ;;  %v547_v27 = vld [vmem:[%s686_s1 + $0xb0] sm:$0xff]   ;;  %v551_v31 = vld [vmem:[%s686_s1 + $0xb8] sm:$0xff]   ;;  %332 = vmatprep.mubr.bf16.mxu0 %v428_v34  ;;  %v298_v40 = vsel %vm296_vm0, %v557_v37, 0 }
   0xd   :  { %493 = vmatpush3.bf16.msra.mxu1 %v531_v11  ;;  %472 = vmatprep.subr.bf16.mxu0 %v532_v12  ;;  %v554_v41 = vld [vmem:[%s687_s0 + $0x10] ss:$0 sps:$4 sm:$0xff]  }
   0xe   :  { %494 = vmatprep.subr.bf16.mxu1 %v533_v13  ;;  %372 = vmatprep.mubr.bf16.mxu1 %v430_v39 }
  0x10   :  { %473 = vmatpush3.bf16.msra.mxu0 %v534_v14 }
  0x11   :  { %495 = vmatpush3.bf16.msra.mxu1 %v535_v15  ;;  %474 = vmatprep.subr.bf16.mxu0 %v536_v16 }
  0x12   :  { %496 = vmatprep.subr.bf16.mxu1 %v537_v17 }
  0x14   :  { %475 = vmatpush3.bf16.msra.mxu0 %v538_v18 }
  0x15   :  { %497 = vmatpush3.bf16.msra.mxu1 %v539_v19  ;;  %476 = vmatprep.subr.bf16.mxu0 %v540_v20 }
  0x16   :  { %498 = vmatprep.subr.bf16.mxu1 %v541_v21 }
  0x18   :  { %477 = vmatpush3.bf16.msra.mxu0 %v542_v22 }
  0x19   :  { %499 = vmatpush3.bf16.msra.mxu1 %v543_v23  ;;  %478 = vmatprep.subr.bf16.mxu0 %v544_v24 }
  0x1a   :  { %500 = vmatprep.subr.bf16.mxu1 %v545_v25 }
  0x1c   :  { %479 = vmatpush3.bf16.msra.mxu0 %v546_v26 }
  0x1d   :  { %501 = vmatpush3.bf16.msra.mxu1 %v547_v27  ;;  %480 = vmatprep.subr.bf16.mxu0 %v548_v28 }
  0x1e   :  { %502 = vmatprep.subr.bf16.mxu1 %v549_v29 }
  0x20   :  { %481 = vmatpush3.bf16.msra.mxu0 %v550_v30 }
  0x21   :  { %503 = vmatpush3.bf16.msra.mxu1 %v551_v31  ;;  %512 = vmatprep.subr.bf16.mxu0 %v558_v36 }
  0x23   :  { %333 = vmatmul.mubr.bf16.vlgmr.msra.gmra.mrb[0].mxu0 %v427_v33 }
  0x24   :  { %373 = vmatmul.mubr.bf16.vlgmr.msra.gmra.mrb[0].mxu1 %v429_v38  ;;  %513 = vmatpush3.bf16.msra.mxu0 %v298_v40 }
  0x25   :  { %514 = vmatprep.mubr.msk.bf16.mxu0 %vm559_vm1, %v558_v36 }
  0x2b   :  { %515 = vmatmul.mubr.msk.bf16.vlgmr.msra.gmra.mrb[4].mxu0 %vm292_vm2, %v554_v41 }
  0xf6   :  { %v482_v42 = vpop.f32.mrb[0].mxu0 }
  0xf7   :  { %v504_v43 = vpop.f32.mrb[0].mxu1  ;;  %v483_v44 = vpop.f32.mrb[1].mxu0 }
  0xf8   :  { %v484_v45 = vadd.f32 %v483_v44, %v482_v42  ;;  %v505_v46 = vpop.f32.mrb[1].mxu1  ;;  %v485_v47 = vpop.f32.mrb[2].mxu0 }
  0xf9   :  { %v506_v48 = vadd.f32 %v505_v46, %v504_v43  ;;  %v486_v49 = vpop.f32.mrb[3].mxu0  ;;  %v507_v50 = vpop.f32.mrb[2].mxu1 }
  0xfa   :  { %v508_v51 = vpop.f32.mrb[3].mxu1 }
  0xfb   :  { %v375_v52 = vadd.f32 %v506_v48, %v484_v45 }
  0xfe   :  { %v414_v53 = vpop.f32.mrb[4].mxu0 }
  0xff   :  { %v415_v54 = vadd.f32 %v414_v53, %v375_v52  ;;  %v516_v55 = vpop.f32.mrb[5].mxu0 }
 0x100   :  { %v417_v56 = vpop.f32.mrb[6].mxu0 }
 0x101   :  { %v420_v57 = vmax.f32 %v415_v54, 0.0  ;;  %v517_v58 = vpop.f32.mrb[7].mxu0 }
 0x103   :  { %v421_v59 = vpack.c.bf16 %v420_v57, %v420_v57 }
 0x105   :  { %422 = vst [vmem:[%s688_s2] sm:$0xf] %v421_v59 }

// kernel: encoder_forward.5
= control target key start
LH: loop header
LB: loop body
LE: loop exit
PB: predicated region body
PF: predicated region fallthrough
CT: control target
= control target key end

     0   :  { %v3413_v34 = vmov 0.0   ;;  %vm324_vm0 = vcmask 1043456   ;;  %vm3414_vm1 = vmmov 0   ;;  %vm320_vm2 = vcmask 64512   ;;  %s3920_s0 = inlined_call_operand.vmem [shape: bf16[520,16], index: 0, kind: input, shape index: {}]   ;;  %s3921_s1 = inlined_call_operand.vmem [shape: bf16[16,520], index: 1, kind: input, shape index: {}]   ;;  %s3922_s3 = inlined_call_operand.vmem [shape: bf16[8,16,2], index: 3, kind: input, shape index: {}]   ;;  %s3923_s7 = inlined_call_operand.vmem [shape: f32[16,16], index: 7, kind: output, shape index: {0}]   ;;  %s3924_s2 = inlined_call_operand.vmem [shape: bf16[8,32,16], index: 2, kind: input, shape index: {}]   ;;  %s3925_s4 = inlined_call_operand.vmem [shape: f32[32,1], index: 4, kind: input, shape index: {}]   ;;  %s3926_s6 = inlined_call_operand.vmem [shape: bf16[1,2,2], index: 6, kind: input, shape index: {}]   ;;  %s3927_s5 = inlined_call_operand.vmem [shape: bf16[9,32,32], index: 5, kind: input, shape index: {}]   ;;  %s3928_s8 = inlined_call_operand.vmem [shape: f32[32,2], index: 8, kind: output, shape index: {1}]  }
   0x1   :  { %v3331_v0 = vld [vmem:[%s3920_s0 + $0x40] sm:$0xff]   ;;  %v3335_v4 = vld [vmem:[%s3920_s0 + $0x48] sm:$0xff]   ;;  %v3339_v8 = vld [vmem:[%s3920_s0 + $0x50] sm:$0xff]   ;;  %vm453_vm3 = vcmask 130048   ;;  %vm1492_vm4 = vcmask 1040384   ;;  %vm1485_vm5 = vcmask 15360  }
   0x2   :  { %v3332_v1 = vld [vmem:[%s3920_s0 + $0xc0] sm:$0xff]   ;;  %2912 = vmatprep.subr.bf16.mxu0 %v3331_v0  ;;  %v3336_v5 = vld [vmem:[%s3920_s0 + $0xc8] sm:$0xff]   ;;  %v3340_v9 = vld [vmem:[%s3920_s0 + $0xd0] sm:$0xff]   ;;  %vm1561_vm6 = vcmask 261120  }
   0x3   :  { %v3333_v2 = vld [vmem:[%s3920_s0] sm:$0xff]   ;;  %2934 = vmatprep.subr.bf16.mxu1 %v3332_v1  ;;  %v3337_v6 = vld [vmem:[%s3920_s0 + $0x8] sm:$0xff]   ;;  %v3341_v10 = vld [vmem:[%s3920_s0 + $0x10] sm:$0xff]  }
   0x4   :  { %v3334_v3 = vld [vmem:[%s3920_s0 + $0x80] sm:$0xff]   ;;  %2913 = vmatpush3.bf16.msra.mxu0 %v3333_v2  ;;  %v3338_v7 = vld [vmem:[%s3920_s0 + $0x88] sm:$0xff]   ;;  %v3342_v11 = vld [vmem:[%s3920_s0 + $0x90] sm:$0xff]  }
   0x5   :  { %2935 = vmatpush3.bf16.msra.mxu1 %v3334_v3  ;;  %2914 = vmatprep.subr.bf16.mxu0 %v3335_v4  ;;  %v3343_v12 = vld [vmem:[%s3920_s0 + $0x58] sm:$0xff]   ;;  %v3347_v16 = vld [vmem:[%s3920_s0 + $0x60] sm:$0xff]   ;;  %v3351_v20 = vld [vmem:[%s3920_s0 + $0x68] sm:$0xff]  }
   0x6   :  { %2936 = vmatprep.subr.bf16.mxu1 %v3336_v5  ;;  %v3344_v13 = vld [vmem:[%s3920_s0 + $0xd8] sm:$0xff]   ;;  %v3348_v17 = vld [vmem:[%s3920_s0 + $0xe0] sm:$0xff]   ;;  %v3352_v21 = vld [vmem:[%s3920_s0 + $0xe8] sm:$0xff]  }
   0x7   :  { %v3345_v14 = vld [vmem:[%s3920_s0 + $0x18] sm:$0xff]   ;;  %v3349_v18 = vld [vmem:[%s3920_s0 + $0x20] sm:$0xff]   ;;  %v3353_v22 = vld [vmem:[%s3920_s0 + $0x28] sm:$0xff]  }
   0x8   :  { %2915 = vmatpush3.bf16.msra.mxu0 %v3337_v6  ;;  %v3346_v15 = vld [vmem:[%s3920_s0 + $0x98] sm:$0xff]   ;;  %v3350_v19 = vld [vmem:[%s3920_s0 + $0xa0] sm:$0xff]   ;;  %v3354_v23 = vld [vmem:[%s3920_s0 + $0xa8] sm:$0xff]  }
   0x9   :  { %2937 = vmatpush3.bf16.msra.mxu1 %v3338_v7  ;;  %2916 = vmatprep.subr.bf16.mxu0 %v3339_v8  ;;  %v3355_v24 = vld [vmem:[%s3920_s0 + $0x70] sm:$0xff]   ;;  %v3359_v28 = vld [vmem:[%s3920_s0 + $0x78] sm:$0xff]   ;;  %v3368_v36 = vld [vmem:[%s3921_s1 + $0xc] ss:$20 sps:$4 sm:$0xff]   ;;  %v3415_v8 = vmov 0  }
   0xa   :  { %2938 = vmatprep.subr.bf16.mxu1 %v3340_v9  ;;  %v3356_v25 = vld [vmem:[%s3920_s0 + $0xf0] sm:$0xff]   ;;  %v3360_v29 = vld [vmem:[%s3920_s0 + $0xf8] sm:$0xff]   ;;  %v3369_v37 = vld [vmem:[%s3920_s0 + $0x100] ss:$0 sps:$4 sm:$0xff]   ;;  %401 = vmatprep.mubr.bf16.mxu1 %v3368_v36 }
   0xb   :  { %v3357_v26 = vld [vmem:[%s3920_s0 + $0x30] sm:$0xff]   ;;  %v3361_v30 = vld [vmem:[%s3920_s0 + $0x38] sm:$0xff]   ;;  %v326_v38 = vsel %vm324_vm0, %v3369_v37, 0  ;;  %v3371_v40 = vld [vmem:[%s3922_s3] sm:$0xff]   ;;  %3330 = vset.pattern.permute.xlu1 %v3415_v8  ;;  %3329 = vset.pattern.permute.xlu0 %v3415_v8 }
   0xc   :  { %2917 = vmatpush3.bf16.msra.mxu0 %v3341_v10  ;;  %v3358_v27 = vld [vmem:[%s3920_s0 + $0xb0] sm:$0xff]   ;;  %v3362_v31 = vld [vmem:[%s3920_s0 + $0xb8] sm:$0xff]   ;;  %v3372_v41 = vld [vmem:[%s3922_s3 + $0x8] sm:$0xff]  }
   0xd   :  { %2939 = vmatpush3.bf16.msra.mxu1 %v3342_v11  ;;  %2918 = vmatprep.subr.bf16.mxu0 %v3343_v12  ;;  %v3363_v32 = vld [vmem:[%s3921_s1] ss:$20 sps:$4 sm:$0xff]   ;;  %v3365_v33 = vld [vmem:[%s3921_s1 + $0x4] ss:$20 sps:$4 sm:$0xff]   ;;  %v3366_v35 = vld [vmem:[%s3921_s1 + $0x8] ss:$20 sps:$4 sm:$0xff]  }
   0xe   :  { %2940 = vmatprep.subr.bf16.mxu1 %v3344_v13  ;;  %360 = vmatprep.mubr.bf16.mxu0 %v3365_v33  ;;  %v3370_v39 = vld [vmem:[%s3921_s1 + $0x10] ss:$20 sps:$4 sm:$0xff]   ;;  %v3374_v2 = vld [vmem:[%s3922_s3 + $0x18] sm:$0xff]   ;;  %v3376_v4 = vld [vmem:[%s3922_s3 + $0x28] sm:$0xff]  }
   0xf   :  { %v3373_v0 = vld [vmem:[%s3922_s3 + $0x10] sm:$0xff]   ;;  %v3375_v3 = vld [vmem:[%s3922_s3 + $0x20] sm:$0xff]   ;;  %v3378_v6 = vld [vmem:[%s3922_s3 + $0x38] sm:$0xff]  }
  0x10   :  { %2919 = vmatpush3.bf16.msra.mxu0 %v3345_v14  ;;  %v3377_v5 = vld [vmem:[%s3922_s3 + $0x30] sm:$0xff]   ;;  %v1450_v10 = vld [vmem:[%s3925_s4] sm:$0xff]  ;;  %v1453_v11 = vld [vmem:[%s3925_s4 + $0x18] sm:$0xff] }
  0x11   :  { %2941 = vmatpush3.bf16.msra.mxu1 %v3346_v15  ;;  %2920 = vmatprep.subr.bf16.mxu0 %v3347_v16  ;;  %v3379_v7 = vld [vmem:[%s3924_s2 + $0x10] sm:$0xff]   ;;  %v1451_v12 = vld [vmem:[%s3925_s4 + $0x8] sm:$0xff] }
  0x12   :  { %2942 = vmatprep.subr.bf16.mxu1 %v3348_v17  ;;  %v1452_v9 = vld [vmem:[%s3925_s4 + $0x10] sm:$0xff]  ;;  %1456 = vperm.xlu0 %3329, %v1450_v10  }
  0x13   :  { %1466 = vperm.xlu1 %3330, %v1452_v9  }
  0x14   :  { %2921 = vmatpush3.bf16.msra.mxu0 %v3349_v18 }
  0x15   :  { %2943 = vmatpush3.bf16.msra.mxu1 %v3350_v19  ;;  %2922 = vmatprep.subr.bf16.mxu0 %v3351_v20 }
  0x16   :  { %2944 = vmatprep.subr.bf16.mxu1 %v3352_v21  ;;  %1461 = vperm.xlu0 %3329, %v1451_v12  }
  0x17   :  { %1471 = vperm.xlu1 %3330, %v1453_v11  }
  0x18   :  { %2923 = vmatpush3.bf16.msra.mxu0 %v3353_v22 }
  0x19   :  { %2945 = vmatpush3.bf16.msra.mxu1 %v3354_v23  ;;  %2924 = vmatprep.subr.bf16.mxu0 %v3355_v24  ;;  %v3380_v23 = vld [vmem:[%s3924_s2 + $0x18] sm:$0xff]   ;;  %v3381_v24 = vld [vmem:[%s3924_s2] sm:$0xff]  }
  0x1a   :  { %2946 = vmatprep.subr.bf16.mxu1 %v3356_v25 }
  0x1c   :  { %2925 = vmatpush3.bf16.msra.mxu0 %v3357_v26 }
  0x1d   :  { %2947 = vmatpush3.bf16.msra.mxu1 %v3358_v27  ;;  %2926 = vmatprep.subr.bf16.mxu0 %v3359_v28 }
  0x1e   :  { %2948 = vmatprep.subr.bf16.mxu1 %v3360_v29 }
  0x20   :  { %2927 = vmatpush3.bf16.msra.mxu0 %v3361_v30 }
  0x21   :  { %2949 = vmatpush3.bf16.msra.mxu1 %v3362_v31  ;;  %3061 = vmatprep.subr.bf16.mxu0 %v3413_v34 }
  0x22   :  { %3067 = vmatprep.subr.bf16.mxu1 %v3413_v34 }
  0x23   :  { %361 = vmatmul.mubr.bf16.vlgmr.msra.gmra.mrb[0].mxu0 %v3363_v32  ;;  %v3382_v32 = vld [vmem:[%s3924_s2 + $0x8] sm:$0xff]  }
  0x24   :  { %402 = vmatmul.mubr.bf16.vlgmr.msra.gmra.mrb[0].mxu1 %v3366_v35  ;;  %3063 = vmatprep.mubr.msk.bf16.mxu0 %vm3414_vm1, %v3413_v34 }
  0x25   :  { %3062 = vmatpush3.bf16.msra.mxu0 %v326_v38  ;;  %3069 = vmatprep.mubr.msk.bf16.mxu1 %vm3414_vm1, %v3413_v34 }
  0x26   :  { %3073 = vmatprep.subr.bf16.mxu0 %v3413_v34  ;;  %3068 = vmatpush3.bf16.msra.mxu1 %v3371_v40 }
  0x2b   :  { %3064 = vmatmul.mubr.msk.bf16.vlgmr.msra.gmra.mrb[4].mxu0 %vm320_vm2, %v3370_v39 }
  0x2c   :  { %3075 = vmatprep.mubr.msk.bf16.mxu0 %vm3414_vm1, %v3413_v34  ;;  %3074 = vmatpush3.bf16.msra.mxu0 %v3372_v41 }
  0x2d   :  { %3091 = vmatprep.subr.bf16.mxu0 %v3413_v34 }
  0xf6   :  { %v2928_v42 = vpop.f32.mrb[0].mxu0 }
  0xf7   :  { %v2950_v43 = vpop.f32.mrb[0].mxu1  ;;  %v2929_v44 = vpop.f32.mrb[1].mxu0 }
  0xf8   :  { %v2930_v45 = vadd.f32 %v2929_v44, %v2928_v42  ;;  %v2951_v46 = vpop.f32.mrb[1].mxu1  ;;  %v2931_v47 = vpop.f32.mrb[2].mxu0  ;;  %v3384_v42 = vld [vmem:[%s3924_s2 + $0x28] sm:$0xff]  }
  0xf9   :  { %v2952_v48 = vadd.f32 %v2951_v46, %v2950_v43  ;;  %v2953_v49 = vpop.f32.mrb[2].mxu1  ;;  %v2932_v50 = vpop.f32.mrb[3].mxu0  ;;  %v3385_v43 = vld [vmem:[%s3924_s2 + $0x30] sm:$0xff]  }
  0xfa   :  { %v2933_v51 = vadd.f32 %v2932_v50, %v2931_v47  ;;  %v2954_v52 = vpop.f32.mrb[3].mxu1 }
  0xfb   :  { %v2955_v53 = vadd.f32 %v2954_v52, %v2953_v49  ;;  %v404_v54 = vadd.f32 %v2952_v48, %v2930_v45 }
  0xfd   :  { %v407_v55 = vadd.f32 %v2955_v53, %v2933_v51  ;;  %v3386_v51 = vld [vmem:[%s3924_s2 + $0x38] sm:$0xff]   ;;  %v3387_v53 = vld [vmem:[%s3924_s2 + $0x40] sm:$0xff]  }
  0xfe   :  { %v444_v56 = vpop.f32.mrb[4].mxu0 }
  0xff   :  { %v445_v57 = vadd.f32 %v444_v56, %v404_v54  ;;  %v3065_v58 = vpop.f32.mrb[5].mxu0 }
 0x100   :  { %v447_v59 = vpop.f32.mrb[6].mxu0 }
 0x101   :  { %v451_v60 = vmax.f32 %v445_v57, 0.0  ;;  %v448_v61 = vadd.f32 %v447_v59, %v407_v55  ;;  %v3066_v62 = vpop.f32.mrb[7].mxu0 }
 0x102   :  { %v3389_v62 = vld [vmem:[%s3924_s2 + $0x50] sm:$0xff]  }
 0x103   :  { %454 = vst.msk [vmem:[%s3923_s7] sm:$0xff] %vm453_vm3, %v451_v60  ;;  %v452_v63 = vmax.f32 %v448_v61, 0.0  ;;  %v3388_v61 = vld [vmem:[%s3924_s2 + $0x48] sm:$0xff]  }
 0x105   :  { %455 = vst.msk [vmem:[%s3923_s7 + $0x8] sm:$0xff] %vm453_vm3, %v452_v63  ;;  %v456_v1 = vpack.c.bf16 %v452_v63, %v451_v60  ;;  %v3390_v63 = vld [vmem:[%s3924_s2 + $0x58] sm:$0xff]  }
 0x107   :  { %3070 = vmatmul.mubr.msk.bf16.vlgmr.msra.gmra.mrb[4].mxu1 %vm453_vm3, %v456_v1  ;;  %3076 = vmatmul.mubr.msk.bf16.vlgmr.msra.gmra.mrb[8].mxu0 %vm453_vm3, %v456_v1 }
 0x108   :  { %3092 = vmatpush3.bf16.msra.mxu0 %v3373_v0  ;;  %3093 = vmatprep.mubr.msk.bf16.mxu0 %vm3414_vm1, %v3413_v34  ;;  %v3391_v0 = vld [vmem:[%s3924_s2 + $0x60] sm:$0xff]  }
 0x109   :  { %3103 = vmatprep.subr.bf16.mxu0 %v3413_v34  ;;  %3081 = vmatprep.mubr.msk.bf16.mxu1 %vm453_vm3, %v3379_v7  ;;  %v1457_v7 = vpop.permute.xlu0 %1456 }
 0x10f   :  { %3094 = vmatmul.mubr.msk.bf16.vlgmr.msra.gmra.mrb[12].mxu0 %vm453_vm3, %v456_v1 }
 0x110   :  { %3104 = vmatpush3.bf16.msra.mxu0 %v3374_v2  ;;  %3105 = vmatprep.mubr.msk.bf16.mxu0 %vm3414_vm1, %v3413_v34  ;;  %v3393_v2 = vld [vmem:[%s3924_s2 + $0x70] sm:$0xff]  }
 0x111   :  { %3115 = vmatprep.subr.bf16.mxu0 %v3413_v34 }
 0x117   :  { %3106 = vmatmul.mubr.msk.bf16.vlgmr.msra.gmra.mrb[16].mxu0 %vm453_vm3, %v456_v1 }
 0x118   :  { %3116 = vmatpush3.bf16.msra.mxu0 %v3375_v3  ;;  %3117 = vmatprep.mubr.msk.bf16.mxu0 %vm3414_vm1, %v3413_v34  ;;  %v3394_v3 = vld [vmem:[%s3924_s2 + $0x78] sm:$0xff]  }
 0x119   :  { %3127 = vmatprep.subr.bf16.mxu0 %v3413_v34 }
 0x11f   :  { %3118 = vmatmul.mubr.msk.bf16.vlgmr.msra.gmra.mrb[20].mxu0 %vm453_vm3, %v456_v1 }
 0x120   :  { %3128 = vmatpush3.bf16.msra.mxu0 %v3376_v4  ;;  %3129 = vmatprep.mubr.msk.bf16.mxu0 %vm3414_vm1, %v3413_v34  ;;  %v3721_v4 = vld [vmem:[%s3926_s6] sm:$0x1] }
 0x121   :  { %3139 = vmatprep.subr.bf16.mxu0 %v3413_v34 }
 0x127   :  { %3130 = vmatmul.mubr.msk.bf16.vlgmr.msra.gmra.mrb[24].mxu0 %vm453_vm3, %v456_v1 }
 0x128   :  { %3140 = vmatpush3.bf16.msra.mxu0 %v3377_v5  ;;  %3141 = vmatprep.mubr.msk.bf16.mxu0 %vm3414_vm1, %v3413_v34  ;;  %v3727_v5 = vsel %vm1492_vm4, %v3721_v4, 0 }
 0x129   :  { %3151 = vmatprep.subr.bf16.mxu0 %v3413_v34 }
 0x12f   :  { %3142 = vmatmul.mubr.msk.bf16.vlgmr.msra.gmra.mrb[28].mxu0 %vm453_vm3, %v456_v1 }
 0x130   :  { %3152 = vmatpush3.bf16.msra.mxu0 %v3378_v6  ;;  %3153 = vmatprep.mubr.msk.bf16.mxu0 %vm3414_vm1, %v3413_v34  ;;  %v3383_v34 = vld [vmem:[%s3924_s2 + $0x20] sm:$0xff]   ;;  %v1467_v6 = vpop.permute.xlu1 %1466 }
 0x131   :  { %3317 = vmatprep.subr.msk.bf16.mxu0 %vm1492_vm4, %v3721_v4 }
 0x134   :  { %v1472_v11 = vpop.permute.xlu1 %1471 }
 0x137   :  { %3154 = vmatmul.mubr.msk.bf16.vlgmr.msra.gmra.mrb[32].mxu0 %vm453_vm3, %v456_v1  ;;  %v3392_v1 = vld [vmem:[%s3924_s2 + $0x68] sm:$0xff]  }
 0x138   :  { %3164 = vmatpush3.bf16.msra.mxu0 %v3727_v5 }
 0x1da   :  { %v502_v13 = vpop.f32.mrb[4].mxu1  ;;  %v557_v14 = vpop.f32.mrb[8].mxu0 }
 0x1db   :  { %v3071_v15 = vpop.f32.mrb[5].mxu1  ;;  %v3077_v16 = vpop.f32.mrb[9].mxu0 }
 0x1dc   :  { %v505_v17 = vpop.f32.mrb[6].mxu1  ;;  %v560_v18 = vpop.f32.mrb[10].mxu0 }
 0x1dd   :  { %v509_v19 = vpack.c.bf16 %v505_v17, %v502_v13  ;;  %v564_v20 = vpack.c.bf16 %v560_v18, %v557_v14  ;;  %v3072_v21 = vpop.f32.mrb[7].mxu1  ;;  %v3078_v22 = vpop.f32.mrb[11].mxu0 }
 0x1de   :  { %v1462_v15 = vpop.permute.xlu0 %1461 }
 0x1df   :  { %3079 = vmatprep.subr.bf16.mxu1 %v564_v20 }
 0x1e0   :  { %3080 = vmatpush3.bf16.msra.mxu1 %v564_v20 }
 0x1e1   :  { %3085 = vmatprep.subr.bf16.mxu1 %v509_v19 }
 0x1e2   :  { %v743_v25 = vpop.f32.mrb[12].mxu0 }
 0x1e3   :  { %3082 = vmatmul.mubr.msk.bf16.vlgmr.msra.gmra.mrb[8].mxu1 %vm453_vm3, %v3380_v23  ;;  %v3095_v26 = vpop.f32.mrb[13].mxu0 }
 0x1e4   :  { %3086 = vmatpush3.bf16.msra.mxu1 %v509_v19  ;;  %v746_v27 = vpop.f32.mrb[14].mxu0  ;;  %3087 = vmatprep.mubr.msk.bf16.mxu1 %vm453_vm3, %v3381_v24  ;;  %v3395_v24 = vld [vmem:[%s3927_s5] sm:$0xff]  }
 0x1e5   :  { %v750_v28 = vpack.c.bf16 %v746_v27, %v743_v25  ;;  %v3096_v29 = vpop.f32.mrb[15].mxu0 }
 0x1e7   :  { %3097 = vmatprep.subr.bf16.mxu1 %v750_v28 }
 0x1ea   :  { %v868_v30 = vpop.f32.mrb[16].mxu0 }
 0x1eb   :  { %v3107_v31 = vpop.f32.mrb[17].mxu0 }
 0x1ec   :  { %v871_v33 = vpop.f32.mrb[18].mxu0  ;;  %v3396_v31 = vld [vmem:[%s3927_s5 + $0x8] sm:$0xff]  }
 0x1ed   :  { %v875_v35 = vpack.c.bf16 %v871_v33, %v868_v30  ;;  %v3108_v36 = vpop.f32.mrb[19].mxu0 }
 0x1ef   :  { %3088 = vmatmul.mubr.msk.bf16.vlgmr.msra.gmra.mrb[8].mxu1 %vm453_vm3, %v3382_v32 }
 0x1f0   :  { %3098 = vmatpush3.bf16.msra.mxu1 %v750_v28  ;;  %3099 = vmatprep.mubr.msk.bf16.mxu1 %vm453_vm3, %v3383_v34 }
 0x1f1   :  { %3109 = vmatprep.subr.bf16.mxu1 %v875_v35 }
 0x1f2   :  { %v993_v37 = vpop.f32.mrb[20].mxu0 }
 0x1f3   :  { %v3119_v38 = vpop.f32.mrb[21].mxu0 }
 0x1f4   :  { %v996_v39 = vpop.f32.mrb[22].mxu0 }
 0x1f5   :  { %v1000_v40 = vpack.c.bf16 %v996_v39, %v993_v37  ;;  %v3120_v41 = vpop.f32.mrb[23].mxu0 }
 0x1fa   :  { %v1118_v44 = vpop.f32.mrb[24].mxu0 }
 0x1fb   :  { %3100 = vmatmul.mubr.msk.bf16.vlgmr.msra.gmra.mrb[8].mxu1 %vm453_vm3, %v3384_v42  ;;  %v3131_v45 = vpop.f32.mrb[25].mxu0  ;;  %v3397_v42 = vld [vmem:[%s3927_s5 + $0x10] sm:$0xff]  }
 0x1fc   :  { %3110 = vmatpush3.bf16.msra.mxu1 %v875_v35  ;;  %v1121_v46 = vpop.f32.mrb[26].mxu0  ;;  %3111 = vmatprep.mubr.msk.bf16.mxu1 %vm453_vm3, %v3385_v43 }
 0x1fd   :  { %3121 = vmatprep.subr.bf16.mxu1 %v1000_v40  ;;  %v1125_v47 = vpack.c.bf16 %v1121_v46, %v1118_v44  ;;  %v3132_v48 = vpop.f32.mrb[27].mxu0 }
 0x202   :  { %v1243_v49 = vpop.f32.mrb[28].mxu0 }
 0x203   :  { %v3143_v50 = vpop.f32.mrb[29].mxu0 }
 0x204   :  { %v1246_v52 = vpop.f32.mrb[30].mxu0 }
 0x205   :  { %v1250_v54 = vpack.c.bf16 %v1246_v52, %v1243_v49  ;;  %v3144_v55 = vpop.f32.mrb[31].mxu0  ;;  %v3398_v49 = vld [vmem:[%s3927_s5 + $0x18] sm:$0xff]  }
 0x207   :  { %3112 = vmatmul.mubr.msk.bf16.vlgmr.msra.gmra.mrb[8].mxu1 %vm453_vm3, %v3386_v51 }
 0x208   :  { %3122 = vmatpush3.bf16.msra.mxu1 %v1000_v40  ;;  %3123 = vmatprep.mubr.msk.bf16.mxu1 %vm453_vm3, %v3387_v53 }
 0x209   :  { %3133 = vmatprep.subr.bf16.mxu1 %v1125_v47 }
 0x20a   :  { %v1368_v56 = vpop.f32.mrb[32].mxu0 }
 0x20b   :  { %v3155_v57 = vpop.f32.mrb[33].mxu0 }
 0x20c   :  { %v1371_v58 = vpop.f32.mrb[34].mxu0 }
 0x20d   :  { %v1375_v59 = vpack.c.bf16 %v1371_v58, %v1368_v56  ;;  %v3156_v60 = vpop.f32.mrb[35].mxu0 }
 0x20e   :  { %v3399_v60 = vld [vmem:[%s3927_s5 + $0x20] sm:$0xff]  }
 0x213   :  { %3124 = vmatmul.mubr.msk.bf16.vlgmr.msra.gmra.mrb[8].mxu1 %vm453_vm3, %v3388_v61 }
 0x214   :  { %3134 = vmatpush3.bf16.msra.mxu1 %v1125_v47  ;;  %3135 = vmatprep.mubr.msk.bf16.mxu1 %vm453_vm3, %v3389_v62 }
 0x215   :  { %3145 = vmatprep.subr.bf16.mxu1 %v1250_v54 }
 0x21f   :  { %3136 = vmatmul.mubr.msk.bf16.vlgmr.msra.gmra.mrb[8].mxu1 %vm453_vm3, %v3390_v63 }
 0x220   :  { %3146 = vmatpush3.bf16.msra.mxu1 %v1250_v54  ;;  %3147 = vmatprep.mubr.msk.bf16.mxu1 %vm453_vm3, %v3391_v0 }
 0x221   :  { %3157 = vmatprep.subr.bf16.mxu1 %v1375_v59 }
 0x22b   :  { %3148 = vmatmul.mubr.msk.bf16.vlgmr.msra.gmra.mrb[8].mxu1 %vm453_vm3, %v3392_v1 }
 0x22c   :  { %3158 = vmatpush3.bf16.msra.mxu1 %v1375_v59  ;;  %3159 = vmatprep.mubr.msk.bf16.mxu1 %vm453_vm3, %v3393_v2 }
 0x22d   :  { %3318 = vmatprep.subr.msk.bf16.mxu1 %vm1492_vm4, %v3721_v4 }
 0x237   :  { %3160 = vmatmul.mubr.msk.bf16.vlgmr.msra.gmra.mrb[8].mxu1 %vm453_vm3, %v3394_v3  ;;  %v3400_v3 = vld [vmem:[%s3927_s5 + $0x28] sm:$0xff]  }
 0x238   :  { %3178 = vmatpush3.bf16.msra.mxu1 %v3727_v5 }
 0x239   :  { %3319 = vmatprep.subr.msk.bf16.mxu1 %vm1492_vm4, %v3721_v4 }
 0x30a   :  { %v3161_v8 = vpop.f32.mrb[8].mxu1 }
 0x30b   :  { %v1431_v9 = vpop.f32.mrb[9].mxu1  ;;  %v3737_v13 = vadd.f32 %v3161_v8, %v1467_v6 }
 0x30c   :  { %v3735_v10 = vadd.f32 %v1457_v7, %v1431_v9  ;;  %v3162_v12 = vpop.f32.mrb[10].mxu1 }
 0x30d   :  { %v3739_v14 = vadd.f32 %v3162_v12, %v1472_v11  ;;  %v1434_v16 = vpop.f32.mrb[11].mxu1  ;;  %v1480_v21 = vmax.f32 %v3737_v13, 0.0 }
 0x30e   :  { %v3741_v17 = vadd.f32 %v1462_v15, %v1434_v16  ;;  %v1478_v19 = vmax.f32 %v3735_v10, 0.0  ;;  %v3401_v10 = vld [vmem:[%s3927_s5 + $0x30] sm:$0xff]  }
 0x30f   :  { %v1481_v18 = vmax.f32 %v3739_v14, 0.0 }
 0x310   :  { %v1479_v20 = vmax.f32 %v3741_v17, 0.0 }
 0x311   :  { %v1483_v23 = vpack.c.bf16 %v1481_v18, %v1480_v21 }
 0x312   :  { %v1482_v22 = vpack.c.bf16 %v1479_v20, %v1478_v19 }
 0x314   :  { %3165 = vmatprep.mubr.msk.bf16.mxu0 %vm1485_vm5, %v1482_v22 }
 0x315   :  { %3166 = vmatmul.mubr.msk.bf16.vlgmr.msra.gmra.mrb[36].mxu0 %vm1485_vm5, %v1483_v23  ;;  %v3402_v23 = vld [vmem:[%s3927_s5 + $0x38] sm:$0xff]  }
 0x316   :  { %3173 = vmatprep.mubr.msk.bf16.mxu0 %vm1561_vm6, %v3395_v24 }
 0x3e8   :  { %v3167_v25 = vpop.f32.mrb[36].mxu0 }
 0x3e9   :  { %v1530_v26 = vpop.f32.mrb[37].mxu0 }
 0x3ea   :  { %v3168_v27 = vpop.f32.mrb[38].mxu0 }
 0x3eb   :  { %v1546_v28 = vpack.c.bf16 %v3168_v27, %v3167_v25  ;;  %v1533_v29 = vpop.f32.mrb[39].mxu0 }
 0x3ec   :  { %v1545_v30 = vpack.c.bf16 %v1533_v29, %v1530_v26 }
 0x3ee   :  { %3169 = vmatprep.subr.bf16.mxu0 %v1545_v30 }
 0x3ef   :  { %3170 = vmatpush3.bf16.msra.mxu0 %v1545_v30 }
 0x3f0   :  { %3171 = vmatprep.subr.bf16.mxu0 %v1546_v28 }
 0x3f3   :  { %3172 = vmatpush3.bf16.msra.mxu0 %v1546_v28 }
 0x3f6   :  { %3174 = vmatmul.mubr.msk.bf16.vlgmr.msra.gmra.mrb[40].mxu0 %vm1561_vm6, %v3396_v31 }
 0x3f7   :  { %3187 = vmatprep.mubr.msk.bf16.mxu0 %vm1561_vm6, %v3397_v42 }
 0x4c9   :  { %v3175_v32 = vpop.f32.mrb[40].mxu0 }
 0x4ca   :  { %v1602_v33 = vpop.f32.mrb[41].mxu0  ;;  %v1619_v35 = vmax.f32 %v3175_v32, 0.0 }
 0x4cb   :  { %v3176_v34 = vpop.f32.mrb[42].mxu0  ;;  %v1617_v38 = vmax.f32 %v1602_v33, 0.0 }
 0x4cc   :  { %v1620_v36 = vmax.f32 %v3176_v34, 0.0  ;;  %v1605_v37 = vpop.f32.mrb[43].mxu0  ;;  %v3403_v34 = vld [vmem:[%s3927_s5 + $0x40] sm:$0xff]  }
 0x4cd   :  { %v1618_v39 = vmax.f32 %v1605_v37, 0.0 }
 0x4ce   :  { %v1622_v40 = vpack.c.bf16 %v1620_v36, %v1619_v35 }
 0x4cf   :  { %v1621_v41 = vpack.c.bf16 %v1618_v39, %v1617_v38 }
 0x4d1   :  { %3179 = vmatprep.mubr.msk.bf16.mxu1 %vm1485_vm5, %v1621_v41  ;;  %v3404_v41 = vld [vmem:[%s3927_s5 + $0x48] sm:$0xff]  }
 0x4d2   :  { %3180 = vmatmul.mubr.msk.bf16.vlgmr.msra.gmra.mrb[12].mxu1 %vm1485_vm5, %v1622_v40 }
 0x4d3   :  { %3192 = vmatpush3.bf16.msra.mxu1 %v3727_v5 }
 0x4d4   :  { %3320 = vmatprep.subr.msk.bf16.mxu1 %vm1492_vm4, %v3721_v4 }
 0x5a5   :  { %v3181_v43 = vpop.f32.mrb[12].mxu1 }
 0x5a6   :  { %v1663_v44 = vpop.f32.mrb[13].mxu1 }
 0x5a7   :  { %v3182_v45 = vpop.f32.mrb[14].mxu1 }
 0x5a8   :  { %v1679_v46 = vpack.c.bf16 %v3182_v45, %v3181_v43  ;;  %v1666_v47 = vpop.f32.mrb[15].mxu1 }
 0x5a9   :  { %v1678_v48 = vpack.c.bf16 %v1666_v47, %v1663_v44 }
 0x5ab   :  { %3183 = vmatprep.subr.bf16.mxu0 %v1678_v48 }
 0x5ac   :  { %3184 = vmatpush3.bf16.msra.mxu0 %v1678_v48 }
 0x5ad   :  { %3185 = vmatprep.subr.bf16.mxu0 %v1679_v46 }
 0x5b0   :  { %3186 = vmatpush3.bf16.msra.mxu0 %v1679_v46 }
 0x5b3   :  { %3188 = vmatmul.mubr.msk.bf16.vlgmr.msra.gmra.mrb[44].mxu0 %vm1561_vm6, %v3398_v49 }
 0x5b4   :  { %3201 = vmatprep.mubr.msk.bf16.mxu0 %vm1561_vm6, %v3399_v60 }
 0x686   :  { %v3189_v50 = vpop.f32.mrb[44].mxu0 }
 0x687   :  { %v1735_v51 = vpop.f32.mrb[45].mxu0  ;;  %v1752_v53 = vmax.f32 %v3189_v50, 0.0 }
 0x688   :  { %v3190_v52 = vpop.f32.mrb[46].mxu0  ;;  %v1750_v56 = vmax.f32 %v1735_v51, 0.0 }
 0x689   :  { %v1753_v54 = vmax.f32 %v3190_v52, 0.0  ;;  %v1738_v55 = vpop.f32.mrb[47].mxu0  ;;  %v3405_v52 = vld [vmem:[%s3927_s5 + $0x50] sm:$0xff]  }
 0x68a   :  { %v1751_v57 = vmax.f32 %v1738_v55, 0.0 }
 0x68b   :  { %v1755_v58 = vpack.c.bf16 %v1753_v54, %v1752_v53 }
 0x68c   :  { %v1754_v59 = vpack.c.bf16 %v1751_v57, %v1750_v56 }
 0x68e   :  { %3193 = vmatprep.mubr.msk.bf16.mxu1 %vm1485_vm5, %v1754_v59  ;;  %v3406_v59 = vld [vmem:[%s3927_s5 + $0x58] sm:$0xff]  }
 0x68f   :  { %3194 = vmatmul.mubr.msk.bf16.vlgmr.msra.gmra.mrb[16].mxu1 %vm1485_vm5, %v1755_v58 }
 0x690   :  { %3206 = vmatpush3.bf16.msra.mxu1 %v3727_v5 }
 0x691   :  { %3321 = vmatprep.subr.msk.bf16.mxu1 %vm1492_vm4, %v3721_v4 }
 0x762   :  { %v3195_v61 = vpop.f32.mrb[16].mxu1 }
 0x763   :  { %v1796_v62 = vpop.f32.mrb[17].mxu1 }
 0x764   :  { %v3196_v63 = vpop.f32.mrb[18].mxu1 }
 0x765   :  { %v1812_v0 = vpack.c.bf16 %v3196_v63, %v3195_v61  ;;  %v1799_v1 = vpop.f32.mrb[19].mxu1 }
 0x766   :  { %v1811_v2 = vpack.c.bf16 %v1799_v1, %v1796_v62 }
 0x768   :  { %3197 = vmatprep.subr.bf16.mxu0 %v1811_v2 }
 0x769   :  { %3198 = vmatpush3.bf16.msra.mxu0 %v1811_v2 }
 0x76a   :  { %3199 = vmatprep.subr.bf16.mxu0 %v1812_v0 }
 0x76d   :  { %3200 = vmatpush3.bf16.msra.mxu0 %v1812_v0 }
 0x770   :  { %3202 = vmatmul.mubr.msk.bf16.vlgmr.msra.gmra.mrb[48].mxu0 %vm1561_vm6, %v3400_v3 }
 0x771   :  { %3215 = vmatprep.mubr.msk.bf16.mxu0 %vm1561_vm6, %v3401_v10 }
 0x843   :  { %v3203_v6 = vpop.f32.mrb[48].mxu0 }
 0x844   :  { %v1868_v7 = vpop.f32.mrb[49].mxu0  ;;  %v3805_v16 = vadd.f32 %v3203_v6, %v1480_v21 }
 0x845   :  { %v3204_v8 = vpop.f32.mrb[50].mxu0  ;;  %v3797_v12 = vadd.f32 %v1868_v7, %v1478_v19 }
 0x846   :  { %v3793_v9 = vadd.f32 %v3204_v8, %v1481_v18  ;;  %v1871_v11 = vpop.f32.mrb[51].mxu0  ;;  %v3407_v8 = vld [vmem:[%s3927_s5 + $0x60] sm:$0xff]  }
 0x847   :  { %v3801_v15 = vadd.f32 %v1871_v11, %v1479_v20 }
 0x848   :  { %v1888_v14 = vpack.c.bf16 %v3793_v9, %v3805_v16 }
 0x849   :  { %v1887_v22 = vpack.c.bf16 %v3801_v15, %v3797_v12 }
 0x84b   :  { %3207 = vmatprep.mubr.msk.bf16.mxu1 %vm1485_vm5, %v1887_v22 }
 0x84c   :  { %3208 = vmatmul.mubr.msk.bf16.vlgmr.msra.gmra.mrb[20].mxu1 %vm1485_vm5, %v1888_v14  ;;  %v3408_v14 = vld [vmem:[%s3927_s5 + $0x68] sm:$0xff]  }
 0x84d   :  { %3220 = vmatpush3.bf16.msra.mxu1 %v3727_v5 }
 0x84e   :  { %3322 = vmatprep.subr.msk.bf16.mxu1 %vm1492_vm4, %v3721_v4 }
 0x91f   :  { %v3209_v13 = vpop.f32.mrb[20].mxu1 }
 0x920   :  { %v1929_v17 = vpop.f32.mrb[21].mxu1 }
 0x921   :  { %v3210_v18 = vpop.f32.mrb[22].mxu1 }
 0x922   :  { %v1945_v19 = vpack.c.bf16 %v3210_v18, %v3209_v13  ;;  %v1932_v20 = vpop.f32.mrb[23].mxu1 }
 0x923   :  { %v1944_v21 = vpack.c.bf16 %v1932_v20, %v1929_v17 }
 0x925   :  { %3211 = vmatprep.subr.bf16.mxu0 %v1944_v21 }
 0x926   :  { %3212 = vmatpush3.bf16.msra.mxu0 %v1944_v21 }
 0x927   :  { %3213 = vmatprep.subr.bf16.mxu0 %v1945_v19 }
 0x92a   :  { %3214 = vmatpush3.bf16.msra.mxu0 %v1945_v19 }
 0x92d   :  { %3216 = vmatmul.mubr.msk.bf16.vlgmr.msra.gmra.mrb[52].mxu0 %vm1561_vm6, %v3402_v23 }
 0x92e   :  { %3229 = vmatprep.mubr.msk.bf16.mxu0 %vm1561_vm6, %v3403_v34 }
 0xa00   :  { %v3217_v24 = vpop.f32.mrb[52].mxu0 }
 0xa01   :  { %v2001_v25 = vpop.f32.mrb[53].mxu0  ;;  %v2018_v27 = vmax.f32 %v3217_v24, 0.0 }
 0xa02   :  { %v3218_v26 = vpop.f32.mrb[54].mxu0  ;;  %v2016_v30 = vmax.f32 %v2001_v25, 0.0  ;;  %v3409_v25 = vld [vmem:[%s3927_s5 + $0x70] sm:$0xff]  }
 0xa03   :  { %v2019_v28 = vmax.f32 %v3218_v26, 0.0  ;;  %v2004_v29 = vpop.f32.mrb[55].mxu0 }
 0xa04   :  { %v2017_v31 = vmax.f32 %v2004_v29, 0.0 }
 0xa05   :  { %v2021_v32 = vpack.c.bf16 %v2019_v28, %v2018_v27 }
 0xa06   :  { %v2020_v33 = vpack.c.bf16 %v2017_v31, %v2016_v30 }
 0xa08   :  { %3221 = vmatprep.mubr.msk.bf16.mxu1 %vm1485_vm5, %v2020_v33 }
 0xa09   :  { %3222 = vmatmul.mubr.msk.bf16.vlgmr.msra.gmra.mrb[24].mxu1 %vm1485_vm5, %v2021_v32  ;;  %v3410_v32 = vld [vmem:[%s3927_s5 + $0x78] sm:$0xff]  }
 0xa0a   :  { %3234 = vmatpush3.bf16.msra.mxu1 %v3727_v5 }
 0xa0b   :  { %3323 = vmatprep.subr.msk.bf16.mxu1 %vm1492_vm4, %v3721_v4 }
 0xadc   :  { %v3223_v35 = vpop.f32.mrb[24].mxu1 }
 0xadd   :  { %v2062_v36 = vpop.f32.mrb[25].mxu1 }
 0xade   :  { %v3224_v37 = vpop.f32.mrb[26].mxu1 }
 0xadf   :  { %v2078_v38 = vpack.c.bf16 %v3224_v37, %v3223_v35  ;;  %v2065_v39 = vpop.f32.mrb[27].mxu1 }
 0xae0   :  { %v2077_v40 = vpack.c.bf16 %v2065_v39, %v2062_v36 }
 0xae2   :  { %3225 = vmatprep.subr.bf16.mxu0 %v2077_v40 }
 0xae3   :  { %3226 = vmatpush3.bf16.msra.mxu0 %v2077_v40 }
 0xae4   :  { %3227 = vmatprep.subr.bf16.mxu0 %v2078_v38 }
 0xae7   :  { %3228 = vmatpush3.bf16.msra.mxu0 %v2078_v38 }
 0xaea   :  { %3230 = vmatmul.mubr.msk.bf16.vlgmr.msra.gmra.mrb[56].mxu0 %vm1561_vm6, %v3404_v41 }
 0xaeb   :  { %3243 = vmatprep.mubr.msk.bf16.mxu0 %vm1561_vm6, %v3405_v52 }
 0xbbd   :  { %v3231_v42 = vpop.f32.mrb[56].mxu0 }
 0xbbe   :  { %v2134_v43 = vpop.f32.mrb[57].mxu0  ;;  %v2151_v45 = vmax.f32 %v3231_v42, 0.0  ;;  %v3411_v42 = vld [vmem:[%s3927_s5 + $0x80] sm:$0xff]  }
 0xbbf   :  { %v3232_v44 = vpop.f32.mrb[58].mxu0  ;;  %v2149_v48 = vmax.f32 %v2134_v43, 0.0 }
 0xbc0   :  { %v2152_v46 = vmax.f32 %v3232_v44, 0.0  ;;  %v2137_v47 = vpop.f32.mrb[59].mxu0 }
 0xbc1   :  { %v2150_v49 = vmax.f32 %v2137_v47, 0.0 }
 0xbc2   :  { %v2154_v50 = vpack.c.bf16 %v2152_v46, %v2151_v45 }
 0xbc3   :  { %v2153_v51 = vpack.c.bf16 %v2150_v49, %v2149_v48  ;;  %v3412_v49 = vld [vmem:[%s3927_s5 + $0x88] sm:$0xff]  }
 0xbc5   :  { %3235 = vmatprep.mubr.msk.bf16.mxu1 %vm1485_vm5, %v2153_v51 }
 0xbc6   :  { %3236 = vmatmul.mubr.msk.bf16.vlgmr.msra.gmra.mrb[28].mxu1 %vm1485_vm5, %v2154_v50 }
 0xbc7   :  { %3248 = vmatpush3.bf16.msra.mxu1 %v3727_v5 }
 0xbc8   :  { %3324 = vmatprep.subr.msk.bf16.mxu1 %vm1492_vm4, %v3721_v4 }
 0xc99   :  { %v3237_v53 = vpop.f32.mrb[28].mxu1 }
 0xc9a   :  { %v2195_v54 = vpop.f32.mrb[29].mxu1 }
 0xc9b   :  { %v3238_v55 = vpop.f32.mrb[30].mxu1 }
 0xc9c   :  { %v2211_v56 = vpack.c.bf16 %v3238_v55, %v3237_v53  ;;  %v2198_v57 = vpop.f32.mrb[31].mxu1 }
 0xc9d   :  { %v2210_v58 = vpack.c.bf16 %v2198_v57, %v2195_v54 }
 0xc9f   :  { %3239 = vmatprep.subr.bf16.mxu0 %v2210_v58 }
 0xca0   :  { %3240 = vmatpush3.bf16.msra.mxu0 %v2210_v58 }
 0xca1   :  { %3241 = vmatprep.subr.bf16.mxu0 %v2211_v56 }
 0xca4   :  { %3242 = vmatpush3.bf16.msra.mxu0 %v2211_v56 }
 0xca7   :  { %3244 = vmatmul.mubr.msk.bf16.vlgmr.msra.gmra.mrb[60].mxu0 %vm1561_vm6, %v3406_v59 }
 0xca8   :  { %3257 = vmatprep.mubr.msk.bf16.mxu0 %vm1561_vm6, %v3407_v8 }
 0xd7a   :  { %v3245_v60 = vpop.f32.mrb[60].mxu0 }
 0xd7b   :  { %v2267_v61 = vpop.f32.mrb[61].mxu0  ;;  %v3860_v3 = vadd.f32 %v3245_v60, %v3805_v16 }
 0xd7c   :  { %v3246_v62 = vpop.f32.mrb[62].mxu0  ;;  %v3854_v1 = vadd.f32 %v2267_v61, %v3797_v12 }
 0xd7d   :  { %v3851_v63 = vadd.f32 %v3246_v62, %v3793_v9  ;;  %v2270_v0 = vpop.f32.mrb[63].mxu0 }
 0xd7e   :  { %v3857_v2 = vadd.f32 %v2270_v0, %v3801_v15 }
 0xd7f   :  { %v2287_v7 = vpack.c.bf16 %v3851_v63, %v3860_v3 }
 0xd80   :  { %v2286_v6 = vpack.c.bf16 %v3857_v2, %v3854_v1 }
 0xd82   :  { %3249 = vmatprep.mubr.msk.bf16.mxu1 %vm1485_vm5, %v2286_v6 }
 0xd83   :  { %3250 = vmatmul.mubr.msk.bf16.vlgmr.msra.gmra.mrb[32].mxu1 %vm1485_vm5, %v2287_v7 }
 0xd84   :  { %3262 = vmatpush3.bf16.msra.mxu1 %v3727_v5 }
 0xd85   :  { %3325 = vmatprep.subr.msk.bf16.mxu1 %vm1492_vm4, %v3721_v4 }
 0xe56   :  { %v3251_v9 = vpop.f32.mrb[32].mxu1 }
 0xe57   :  { %v2328_v11 = vpop.f32.mrb[33].mxu1 }
 0xe58   :  { %v3252_v12 = vpop.f32.mrb[34].mxu1 }
 0xe59   :  { %v2344_v15 = vpack.c.bf16 %v3252_v12, %v3251_v9  ;;  %v2331_v16 = vpop.f32.mrb[35].mxu1 }
 0xe5a   :  { %v2343_v22 = vpack.c.bf16 %v2331_v16, %v2328_v11 }
 0xe5c   :  { %3253 = vmatprep.subr.bf16.mxu0 %v2343_v22 }
 0xe5d   :  { %3254 = vmatpush3.bf16.msra.mxu0 %v2343_v22 }
 0xe5e   :  { %3255 = vmatprep.subr.bf16.mxu0 %v2344_v15 }
 0xe61   :  { %3256 = vmatpush3.bf16.msra.mxu0 %v2344_v15 }
 0xe64   :  { %3258 = vmatmul.mubr.msk.bf16.vlgmr.msra.gmra.mrb[64].mxu0 %vm1561_vm6, %v3408_v14 }
 0xe65   :  { %3271 = vmatprep.mubr.msk.bf16.mxu0 %vm1561_vm6, %v3409_v25 }
 0xf37   :  { %v3259_v4 = vpop.f32.mrb[64].mxu0 }
 0xf38   :  { %v2400_v10 = vpop.f32.mrb[65].mxu0  ;;  %v2417_v17 = vmax.f32 %v3259_v4, 0.0 }
 0xf39   :  { %v3260_v13 = vpop.f32.mrb[66].mxu0  ;;  %v2415_v20 = vmax.f32 %v2400_v10, 0.0 }
 0xf3a   :  { %v2418_v18 = vmax.f32 %v3260_v13, 0.0  ;;  %v2403_v19 = vpop.f32.mrb[67].mxu0 }
 0xf3b   :  { %v2416_v21 = vmax.f32 %v2403_v19, 0.0 }
 0xf3c   :  { %v2420_v23 = vpack.c.bf16 %v2418_v18, %v2417_v17 }
 0xf3d   :  { %v2419_v24 = vpack.c.bf16 %v2416_v21, %v2415_v20 }
 0xf3f   :  { %3263 = vmatprep.mubr.msk.bf16.mxu1 %vm1485_vm5, %v2419_v24 }
 0xf40   :  { %3264 = vmatmul.mubr.msk.bf16.vlgmr.msra.gmra.mrb[36].mxu1 %vm1485_vm5, %v2420_v23 }
 0xf41   :  { %3276 = vmatpush3.bf16.msra.mxu1 %v3727_v5 }
0x1013   :  { %v3265_v26 = vpop.f32.mrb[36].mxu1 }
0x1014   :  { %v2461_v27 = vpop.f32.mrb[37].mxu1 }
0x1015   :  { %v3266_v28 = vpop.f32.mrb[38].mxu1 }
0x1016   :  { %v2477_v29 = vpack.c.bf16 %v3266_v28, %v3265_v26  ;;  %v2464_v30 = vpop.f32.mrb[39].mxu1 }
0x1017   :  { %v2476_v31 = vpack.c.bf16 %v2464_v30, %v2461_v27 }
0x1019   :  { %3267 = vmatprep.subr.bf16.mxu0 %v2476_v31 }
0x101a   :  { %3268 = vmatpush3.bf16.msra.mxu0 %v2476_v31 }
0x101b   :  { %3269 = vmatprep.subr.bf16.mxu0 %v2477_v29 }
0x101e   :  { %3270 = vmatpush3.bf16.msra.mxu0 %v2477_v29 }
0x1021   :  { %3272 = vmatmul.mubr.msk.bf16.vlgmr.msra.gmra.mrb[68].mxu0 %vm1561_vm6, %v3410_v32 }
0x1022   :  { %3285 = vmatprep.mubr.msk.bf16.mxu0 %vm1561_vm6, %v3411_v42 }
0x10f4   :  { %v3273_v5 = vpop.f32.mrb[68].mxu0 }
0x10f5   :  { %v2533_v33 = vpop.f32.mrb[69].mxu0  ;;  %v2550_v35 = vmax.f32 %v3273_v5, 0.0 }
0x10f6   :  { %v3274_v34 = vpop.f32.mrb[70].mxu0  ;;  %v2548_v38 = vmax.f32 %v2533_v33, 0.0 }
0x10f7   :  { %v2551_v36 = vmax.f32 %v3274_v34, 0.0  ;;  %v2536_v37 = vpop.f32.mrb[71].mxu0 }
0x10f8   :  { %v2549_v39 = vmax.f32 %v2536_v37, 0.0 }
0x10f9   :  { %v2553_v40 = vpack.c.bf16 %v2551_v36, %v2550_v35 }
0x10fa   :  { %v2552_v41 = vpack.c.bf16 %v2549_v39, %v2548_v38 }
0x10fc   :  { %3277 = vmatprep.mubr.msk.bf16.mxu1 %vm1485_vm5, %v2552_v41 }
0x10fd   :  { %3278 = vmatmul.mubr.msk.bf16.vlgmr.msra.gmra.mrb[40].mxu1 %vm1485_vm5, %v2553_v40 }
0x11d0   :  { %v3279_v43 = vpop.f32.mrb[40].mxu1 }
0x11d1   :  { %v2594_v44 = vpop.f32.mrb[41].mxu1 }
0x11d2   :  { %v3280_v45 = vpop.f32.mrb[42].mxu1 }
0x11d3   :  { %v2610_v46 = vpack.c.bf16 %v3280_v45, %v3279_v43  ;;  %v2597_v47 = vpop.f32.mrb[43].mxu1 }
0x11d4   :  { %v2609_v48 = vpack.c.bf16 %v2597_v47, %v2594_v44 }
0x11d6   :  { %3281 = vmatprep.subr.bf16.mxu0 %v2609_v48 }
0x11d7   :  { %3282 = vmatpush3.bf16.msra.mxu0 %v2609_v48 }
0x11d8   :  { %3283 = vmatprep.subr.bf16.mxu0 %v2610_v46 }
0x11db   :  { %3284 = vmatpush3.bf16.msra.mxu0 %v2610_v46 }
0x11de   :  { %3286 = vmatmul.mubr.msk.bf16.vlgmr.msra.gmra.mrb[72].mxu0 %vm1561_vm6, %v3412_v49 }
0x12b1   :  { %v3287_v50 = vpop.f32.mrb[72].mxu0 }
0x12b2   :  { %v2683_v51 = vadd.f32 %v3287_v50, %v3860_v3  ;;  %v2666_v52 = vpop.f32.mrb[73].mxu0 }
0x12b3   :  { %v2681_v53 = vadd.f32 %v2666_v52, %v3854_v1  ;;  %v3288_v54 = vpop.f32.mrb[74].mxu0 }
0x12b4   :  { %2687 = vst.msk [vmem:[%s3928_s8 + $0x10] sm:$0xff] %vm1485_vm5, %v2683_v51  ;;  %v2684_v55 = vadd.f32 %v3288_v54, %v3851_v63  ;;  %v2669_v56 = vpop.f32.mrb[75].mxu0 }
0x12b5   :  { %2685 = vst.msk [vmem:[%s3928_s8] sm:$0xff] %vm1485_vm5, %v2681_v53  ;;  %v2682_v57 = vadd.f32 %v2669_v56, %v3857_v2 }
0x12b6   :  { %2688 = vst.msk [vmem:[%s3928_s8 + $0x18] sm:$0xff] %vm1485_vm5, %v2684_v55 }
0x12b7   :  { %2686 = vst.msk [vmem:[%s3928_s8 + $0x8] sm:$0xff] %vm1485_vm5, %v2682_v57 }

</bundles_post_ra>
